<compile_context>
chip_gen: v7x
topology: tpu7x:2x2x1
jax: 0.10.0
libtpu: 0.0.40
codegen_flags: <defaults>
</compile_context>

<pallas_src>
import functools

import numpy as np
import jax
import jax.numpy as jnp
from jax import lax
from jax.experimental import pallas as pl
from jax.experimental.pallas import tpu as pltpu


def encoder_kernel(x_ref, wx0_ref, wf_ref, whh1_ref, b1_ref, wfc_ref, bfc_ref,
                   out_ref,
                   xg_s, h0_s, c0_s, h1_s, c1_s,
                   *, t_real, mask_tail):
    Bp, H = h0_s.shape
    tc = x_ref.shape[0] // Bp          # timesteps in this chunk
    H3, H4 = 3 * H, 4 * H

    t_blk = pl.program_id(0)
    chunk_start = t_blk * tc

    @pl.when(t_blk == 0)
    def _init():
        z = jnp.zeros((Bp, H), jnp.float32)
        h0_s[...] = z
        c0_s[...] = z
        h1_s[...] = z
        c1_s[...] = z

    # Layer-0 input projection for the whole chunk as one MXU matmul
    # (M = tc*Bp rows, bf16 operands, f32 accumulate).  b0 rides along via the
    # ones column appended to x / bias row appended to wx0.
    xg_s[...] = jnp.dot(x_ref[...], wx0_ref[...],
                        preferred_element_type=jnp.float32)

    wf = wf_ref[...]                   # (H, 8H) = [W_hh0 | W_ih1], bf16
    whh1 = whh1_ref[...]               # (H, 4H), bf16
    # Hoisted: JAX does not CSE broadcast_in_dim inside the (unrolled) loop.
    b1b = jnp.broadcast_to(b1_ref[...], (Bp, H4))

    def bf16(v):
        return v.astype(jnp.bfloat16)

    def activate(gates, c_prev):
        # Gate columns pre-permuted to [i, f, o | g]: two contiguous activations.
        # TODO(synk): for larger H, pad each gate to a full 128-lane tile (or use
        # pltpu.roll on the idle XLU slot) to keep sub-vreg lane slices off the
        # serial chain; at H=32 confirm via bundle dump before adding complexity.
        sig = jax.nn.sigmoid(gates[:, :H3])
        g = jnp.tanh(gates[:, H3:])
        i = sig[:, :H]
        f = sig[:, H:2 * H]
        o = sig[:, 2 * H:]
        c_new = f * c_prev + i * g
        return o * jnp.tanh(c_new), c_new

    # Software-pipelined stacked recurrence.
    h0 = h0_s[...]
    c0 = c0_s[...]
    h1 = h1_s[...]
    c1 = c1_s[...]

    # Prologue: layer-0 step `chunk_start` (its layer-1 partner, step
    # chunk_start-1, was already completed by the previous chunk / init).
    r = jnp.dot(bf16(h0), wf, preferred_element_type=jnp.float32)
    h0, c0 = activate(xg_s[pl.ds(0, Bp), :] + r[:, :H4], c0)

    def step(j, carry):
        h0, c0, h1, c1 = carry
        # Both matmuls depend only on the previous iteration's state, so the
        # two layer chains run in parallel on the MXU.
        r = jnp.dot(bf16(h0), wf, preferred_element_type=jnp.float32)   # (Bp,8H)
        w = jnp.dot(bf16(h1), whh1, preferred_element_type=jnp.float32)  # (Bp,4H)
        # Layer 1, global step chunk_start + j - 1.
        h1n, c1n = activate(r[:, H4:] + w + b1b, c1)
        # Layer 0, global step chunk_start + j.
        row = pl.multiple_of(j * Bp, 8)
        h0n, c0n = activate(xg_s[pl.ds(row, Bp), :] + r[:, :H4], c0)
        if mask_tail:
            v0 = chunk_start + j < t_real
            v1 = chunk_start + j - 1 < t_real
            h0n = jnp.where(v0, h0n, h0)
            c0n = jnp.where(v0, c0n, c0)
            h1n = jnp.where(v1, h1n, h1)
            c1n = jnp.where(v1, c1n, c1)
        return h0n, c0n, h1n, c1n

    unroll = True if tc <= 8 else 8
    h0, c0, h1, c1 = lax.fori_loop(1, tc, step, (h0, c0, h1, c1),
                                   unroll=unroll)

    # Epilogue: drain the pipeline — layer-1 step chunk_start + tc - 1.
    r = jnp.dot(bf16(h0), wf, preferred_element_type=jnp.float32)
    w = jnp.dot(bf16(h1), whh1, preferred_element_type=jnp.float32)
    h1n, c1n = activate(r[:, H4:] + w + b1b, c1)
    if mask_tail:
        v1 = chunk_start + tc - 1 < t_real
        h1n = jnp.where(v1, h1n, h1)
        c1n = jnp.where(v1, c1n, c1)
    h1, c1 = h1n, c1n

    # Persist synced states across time chunks (grid iterations).
    h0_s[...] = h0
    c0_s[...] = c0
    h1_s[...] = h1
    c1_s[...] = c1

    @pl.when(t_blk == pl.num_programs(0) - 1)
    def _final():
        out_ref[...] = (jnp.dot(bf16(h1), wfc_ref[...],
                                preferred_element_type=jnp.float32)
                        + bfc_ref[...])


def _tile_bytes(shape, dtype):
    """VMEM footprint of a buffer after (sublane, lane) tile padding."""
    item = np.dtype(dtype).itemsize
    sublane = 8 * (4 // item)            # f32 -> 8, bf16 -> 16
    dims = list(shape)
    if len(dims) >= 1:
        dims[-1] = -(-dims[-1] // 128) * 128
    if len(dims) >= 2:
        dims[-2] = -(-dims[-2] // sublane) * sublane
    n = 1
    for d in dims:
        n *= d
    return n * item


def encoder_forward(x, params, *, max_chunk=256):
    """x: (B, T, D) float32. Returns (B, O) float32."""
    B, T, D = x.shape
    H = params["whh1"].shape[0]
    O = params["wfc"].shape[1]
    Bp = ((B + 7) // 8) * 8              # pad batch to full sublanes

    tc = max(1, min(T, max_chunk))       # timesteps per grid step
    n_chunks = -(-T // tc)
    Tp = n_chunks * tc                   # time padded to a chunk multiple

    # time-major, batch padded, bf16, ones column appended (folds b0 into the
    # chunk projection), flattened so each chunk is a plain (tc*Bp, D+1) operand.
    x_tm = jnp.transpose(x, (1, 0, 2)).astype(jnp.bfloat16)
    x_tm = jnp.pad(x_tm, ((0, Tp - T), (0, Bp - B), (0, 0)))
    ones = jnp.ones((Tp, Bp, 1), jnp.bfloat16)
    x2d = jnp.concatenate([x_tm, ones], axis=-1).reshape(Tp * Bp, D + 1)

    full = lambda t: (0, 0)
    in_specs = [
        pl.BlockSpec((tc * Bp, D + 1), lambda t: (t, 0)),
        pl.BlockSpec(params["wx0"].shape, full),
        pl.BlockSpec(params["wf"].shape, full),
        pl.BlockSpec(params["whh1"].shape, full),
        pl.BlockSpec(params["b1"].shape, full),
        pl.BlockSpec(params["wfc"].shape, full),
        pl.BlockSpec(params["bfc"].shape, full),
    ]
    out_spec = pl.BlockSpec((Bp, O), full)

    scratch = [
        pltpu.VMEM((tc * Bp, 4 * H), jnp.float32),   # chunk input projection
        pltpu.VMEM((Bp, H), jnp.float32),            # h layer 0
        pltpu.VMEM((Bp, H), jnp.float32),            # c layer 0
        pltpu.VMEM((Bp, H), jnp.float32),            # h layer 1
        pltpu.VMEM((Bp, H), jnp.float32),            # c layer 1
    ]

    # VMEM budget: double-buffered blocks + scratch, counted with tile padding;
    # capped at 3/4 of physical VMEM (64 MiB/TC on v7x, 128 MiB on v5e/v6e).
    resident = 2 * _tile_bytes((tc * Bp, D + 1), jnp.bfloat16)
    for name in ("wx0", "wf", "whh1", "b1", "wfc", "bfc"):
        resident += 2 * _tile_bytes(params[name].shape, params[name].dtype)
    resident += 2 * _tile_bytes((Bp, O), jnp.float32)
    resident += _tile_bytes((tc * Bp, 4 * H), jnp.float32)
    resident += 4 * _tile_bytes((Bp, H), jnp.float32)
    try:
        cap = getattr(pltpu.get_tpu_info(), "vmem_capacity_bytes", 64 << 20)
    except Exception:
        cap = 64 << 20
    vmem_limit = int(min(max(resident + (8 << 20), 32 << 20), (cap * 3) // 4))

    kernel = functools.partial(encoder_kernel, t_real=T, mask_tail=(Tp != T))
    out = pl.pallas_call(
        kernel,
        out_shape=jax.ShapeDtypeStruct((Bp, O), jnp.float32),
        grid_spec=pltpu.PrefetchScalarGridSpec(
            num_scalar_prefetch=0,
            grid=(n_chunks,),
            in_specs=in_specs,
            out_specs=out_spec,
            scratch_shapes=scratch,
        ),
        compiler_params=pltpu.CompilerParams(
            dimension_semantics=("arbitrary",),
            vmem_limit_bytes=vmem_limit,
        ),
    )(x2d, params["wx0"], params["wf"], params["whh1"],
      params["b1"], params["wfc"], params["bfc"])
    # TODO(synk): on v7x (2 TensorCores) with real batch sizes (B >= 16), add a
    # leading core-parallel batch grid axis so each core runs an independent
    # half-batch recurrence; not worthwhile at B=2.
    return out[:B]


def _perm_ifog(w):
    """Permute the trailing 4H gate axis from PyTorch [i,f,g,o] to [i,f,o,g]."""
    H = w.shape[-1] // 4
    return jnp.concatenate(
        [w[..., :2 * H], w[..., 3 * H:], w[..., 2 * H:3 * H]], axis=-1)


def init_params(key, input_size, hidden_size, output_size):
    """PyTorch-style uniform(-1/sqrt(H), 1/sqrt(H)) init, packed for the kernel."""
    H = hidden_size
    ks = jax.random.split(key, 10)
    s = 1.0 / jnp.sqrt(jnp.float32(H))

    def u(k, shape):
        return jax.random.uniform(k, shape, jnp.float32, -s, s)

    # PyTorch-shaped parameters (gate order [i, f, g, o]).
    wih0, whh0 = u(ks[0], (4 * H, input_size)), u(ks[1], (4 * H, H))
    bih0, bhh0 = u(ks[2], (4 * H,)), u(ks[3], (4 * H,))
    wih1, whh1 = u(ks[4], (4 * H, H)), u(ks[5], (4 * H, H))
    bih1, bhh1 = u(ks[6], (4 * H,)), u(ks[7], (4 * H,))
    wfc = jax.random.uniform(ks[8], (output_size, H), jnp.float32, -s, s)
    bfc = jax.random.uniform(ks[9], (output_size,), jnp.float32, -s, s)

    bf = jnp.bfloat16
    return {
        # (D+1, 4H): layer-0 input weight with fused bias row (bias-via-matmul).
        "wx0": _perm_ifog(jnp.concatenate(
            [wih0.T, (bih0 + bhh0).reshape(1, 4 * H)], axis=0)).astype(bf),
        # (H, 8H): [W_hh0 | W_ih1] — both consumers of h0, fused.
        "wf": jnp.concatenate(
            [_perm_ifog(whh0.T), _perm_ifog(wih1.T)], axis=1).astype(bf),
        # (H, 4H): layer-1 recurrent weight (off the critical path).
        "whh1": _perm_ifog(whh1.T).astype(bf),
        "b1": _perm_ifog((bih1 + bhh1).reshape(1, 4 * H)),      # f32 (1, 4H)
        "wfc": wfc.T.astype(bf),                                # (H, O)
        "bfc": bfc.reshape(1, output_size),                     # f32 (1, O)
    }


def encoder_reference(x, params):
    """Pure-JAX reference with the same layout and bf16 matmul-operand policy."""
    B, T, D = x.shape
    H = params["whh1"].shape[0]
    H4 = 4 * H
    bf, f32 = jnp.bfloat16, jnp.float32

    wih0 = params["wx0"][:D]
    b0 = params["wx0"][D:].astype(f32)
    whh0, wih1 = params["wf"][:, :H4], params["wf"][:, H4:]
    whh1, b1 = params["whh1"], params["b1"]

    def mm(a, b):
        return jnp.dot(a.astype(bf), b, preferred_element_type=f32)

    def act(g, c):
        i = jax.nn.sigmoid(g[:, :H])
        f = jax.nn.sigmoid(g[:, H:2 * H])
        o = jax.nn.sigmoid(g[:, 2 * H:3 * H])
        gg = jnp.tanh(g[:, 3 * H:])
        c = f * c + i * gg
        return o * jnp.tanh(c), c

    h0 = c0 = h1 = c1 = jnp.zeros((B, H), f32)
    for t in range(T):
        h0, c0 = act(mm(x[:, t], wih0) + mm(h0, whh0) + b0, c0)
        h1, c1 = act(mm(h0, wih1) + mm(h1, whh1) + b1, c1)
    return mm(h1, params["wfc"]) + params["bfc"]


if __name__ == "__main__":
    input_size, hidden_size, output_size = 16, 32, 8
    key = jax.random.PRNGKey(0)
    k_p, k0, k1, k2 = jax.random.split(key, 4)
    params = init_params(k_p, input_size, hidden_size, output_size)

    # (batch, seq, chunk cap): single-chunk, multi-chunk, and padded-tail
    # (T not a multiple of the chunk) paths.
    cases = [(k0, 2, 8, 256), (k1, 2, 24, 8), (k2, 2, 21, 8)]
    for kx, B, T, mc in cases:
        x = jax.random.normal(kx, (B, T, input_size), jnp.float32)
        out = encoder_forward(x, params, max_chunk=mc)
        jax.block_until_ready(out)
        assert out.shape == (B, output_size)
        ref = encoder_reference(x, params)
        err = jnp.max(jnp.abs(out - ref))
        # 2e-3 covers occasional one-ulp bf16-cast divergence of the h states.
        assert jnp.allclose(out, ref, rtol=2e-3, atol=2e-3), (
            f"B={B} T={T} chunk={mc}: max abs diff {err}")
    print("KERNEL_OK")
</pallas_src>

<mosaic_0001>
module attributes {stable_mosaic.version = 11 : i64} {
  func.func @encoder_kernel(%arg0: i32, %arg1: memref<64x17xbf16, #tpu.memory_space<vmem>>, %arg2: memref<17x128xbf16, #tpu.memory_space<vmem>>, %arg3: memref<32x256xbf16, #tpu.memory_space<vmem>>, %arg4: memref<32x128xbf16, #tpu.memory_space<vmem>>, %arg5: memref<1x128xf32, #tpu.memory_space<vmem>>, %arg6: memref<32x8xbf16, #tpu.memory_space<vmem>>, %arg7: memref<1x8xf32, #tpu.memory_space<vmem>>, %arg8: memref<8x8xf32, #tpu.memory_space<vmem>>, %arg9: memref<64x128xf32, #tpu.memory_space<vmem>>, %arg10: memref<8x32xf32, #tpu.memory_space<vmem>>, %arg11: memref<8x32xf32, #tpu.memory_space<vmem>>, %arg12: memref<8x32xf32, #tpu.memory_space<vmem>>, %arg13: memref<8x32xf32, #tpu.memory_space<vmem>>) attributes {dimension_semantics = [#tpu.dimension_semantics<arbitrary>], iteration_bounds = array<i64: 1>, scalar_prefetch = 0 : i64, scratch_operands = 5 : i64, tpu.core_type = #tpu.core_type<tc>, window_params = [{transform_indices = @transform_0, window_bounds = array<i64: 64, 17>}, {pipeline_mode = #tpu.pipeline_mode<synchronous>, transform_indices = @transform_1, window_bounds = array<i64: 17, 128>}, {pipeline_mode = #tpu.pipeline_mode<synchronous>, transform_indices = @transform_2, window_bounds = array<i64: 32, 256>}, {pipeline_mode = #tpu.pipeline_mode<synchronous>, transform_indices = @transform_3, window_bounds = array<i64: 32, 128>}, {pipeline_mode = #tpu.pipeline_mode<synchronous>, transform_indices = @transform_4, window_bounds = array<i64: 1, 128>}, {pipeline_mode = #tpu.pipeline_mode<synchronous>, transform_indices = @transform_5, window_bounds = array<i64: 32, 8>}, {pipeline_mode = #tpu.pipeline_mode<synchronous>, transform_indices = @transform_6, window_bounds = array<i64: 1, 8>}, {pipeline_mode = #tpu.pipeline_mode<synchronous>, transform_indices = @transform_7, window_bounds = array<i64: 8, 8>}]} {
    %c0_i32 = arith.constant 0 : i32
    %0 = arith.cmpi eq, %arg0, %c0_i32 : i32
    %1 = arith.extui %0 : i1 to i32
    %c0_i32_0 = arith.constant 0 : i32
    %2 = arith.cmpi ne, %1, %c0_i32_0 : i32
    scf.if %2 {
      %cst_79 = arith.constant 0.000000e+00 : f32
      %382 = vector.broadcast %cst_79 : f32 to vector<8x32xf32>
      %c0_80 = arith.constant 0 : index
      %c0_81 = arith.constant 0 : index
      %383 = vector.load %arg10[%c0_80, %c0_81] : memref<8x32xf32, #tpu.memory_space<vmem>>, vector<8x32xf32>
      tpu.vector_store %arg10[%c0_80, %c0_81], %382 {strides = array<i32>} : memref<8x32xf32, #tpu.memory_space<vmem>>, vector<8x32xf32>,
      %c0_82 = arith.constant 0 : index
      %c0_83 = arith.constant 0 : index
      %384 = vector.load %arg11[%c0_82, %c0_83] : memref<8x32xf32, #tpu.memory_space<vmem>>, vector<8x32xf32>
      tpu.vector_store %arg11[%c0_82, %c0_83], %382 {strides = array<i32>} : memref<8x32xf32, #tpu.memory_space<vmem>>, vector<8x32xf32>,
      %c0_84 = arith.constant 0 : index
      %c0_85 = arith.constant 0 : index
      %385 = vector.load %arg12[%c0_84, %c0_85] : memref<8x32xf32, #tpu.memory_space<vmem>>, vector<8x32xf32>
      tpu.vector_store %arg12[%c0_84, %c0_85], %382 {strides = array<i32>} : memref<8x32xf32, #tpu.memory_space<vmem>>, vector<8x32xf32>,
      %c0_86 = arith.constant 0 : index
      %c0_87 = arith.constant 0 : index
      %386 = vector.load %arg13[%c0_86, %c0_87] : memref<8x32xf32, #tpu.memory_space<vmem>>, vector<8x32xf32>
      tpu.vector_store %arg13[%c0_86, %c0_87], %382 {strides = array<i32>} : memref<8x32xf32, #tpu.memory_space<vmem>>, vector<8x32xf32>,
    } else {
    }
    %c0 = arith.constant 0 : index
    %c0_1 = arith.constant 0 : index
    %3 = vector.load %arg1[%c0, %c0_1] : memref<64x17xbf16, #tpu.memory_space<vmem>>, vector<64x17xbf16>
    %c0_2 = arith.constant 0 : index
    %c0_3 = arith.constant 0 : index
    %4 = vector.load %arg2[%c0_2, %c0_3] : memref<17x128xbf16, #tpu.memory_space<vmem>>, vector<17x128xbf16>
    %cst = arith.constant dense<0.000000e+00> : vector<64x128xf32>
    %5 = tpu.matmul %3, %4, %cst {dimension_numbers = #tpu.dot_dimension_numbers<[1], [0], [0], [1], [0, 0, 1, 1], [], []>} : vector<64x17xbf16>, vector<17x128xbf16>, vector<64x128xf32> -> vector<64x128xf32>
    %c0_4 = arith.constant 0 : index
    %c0_5 = arith.constant 0 : index
    %6 = vector.load %arg9[%c0_4, %c0_5] : memref<64x128xf32, #tpu.memory_space<vmem>>, vector<64x128xf32>
    tpu.vector_store %arg9[%c0_4, %c0_5], %5 {strides = array<i32>} : memref<64x128xf32, #tpu.memory_space<vmem>>, vector<64x128xf32>,
    %c0_6 = arith.constant 0 : index
    %c0_7 = arith.constant 0 : index
    %7 = vector.load %arg3[%c0_6, %c0_7] : memref<32x256xbf16, #tpu.memory_space<vmem>>, vector<32x256xbf16>
    %c0_8 = arith.constant 0 : index
    %c0_9 = arith.constant 0 : index
    %8 = vector.load %arg4[%c0_8, %c0_9] : memref<32x128xbf16, #tpu.memory_space<vmem>>, vector<32x128xbf16>
    %c0_10 = arith.constant 0 : index
    %c0_11 = arith.constant 0 : index
    %9 = vector.load %arg5[%c0_10, %c0_11] : memref<1x128xf32, #tpu.memory_space<vmem>>, vector<1x128xf32>
    %10 = vector.shape_cast %9 : vector<1x128xf32> to vector<1x128xf32>
    %11 = vector.broadcast %10 : vector<1x128xf32> to vector<8x128xf32>
    %c0_12 = arith.constant 0 : index
    %c0_13 = arith.constant 0 : index
    %12 = vector.load %arg10[%c0_12, %c0_13] : memref<8x32xf32, #tpu.memory_space<vmem>>, vector<8x32xf32>
    %c0_14 = arith.constant 0 : index
    %c0_15 = arith.constant 0 : index
    %13 = vector.load %arg11[%c0_14, %c0_15] : memref<8x32xf32, #tpu.memory_space<vmem>>, vector<8x32xf32>
    %c0_16 = arith.constant 0 : index
    %c0_17 = arith.constant 0 : index
    %14 = vector.load %arg12[%c0_16, %c0_17] : memref<8x32xf32, #tpu.memory_space<vmem>>, vector<8x32xf32>
    %c0_18 = arith.constant 0 : index
    %c0_19 = arith.constant 0 : index
    %15 = vector.load %arg13[%c0_18, %c0_19] : memref<8x32xf32, #tpu.memory_space<vmem>>, vector<8x32xf32>
    %16 = arith.truncf %12 : vector<8x32xf32> to vector<8x32xbf16>
    %cst_20 = arith.constant dense<0.000000e+00> : vector<8x256xf32>
    %17 = tpu.matmul %16, %7, %cst_20 {dimension_numbers = #tpu.dot_dimension_numbers<[1], [0], [0], [1], [0, 0, 1, 1], [], []>} : vector<8x32xbf16>, vector<32x256xbf16>, vector<8x256xf32> -> vector<8x256xf32>
    %c0_21 = arith.constant 0 : index
    %c0_22 = arith.constant 0 : index
    %18 = vector.load %arg9[%c0_21, %c0_22] : memref<64x128xf32, #tpu.memory_space<vmem>>, vector<8x128xf32>
    %19 = vector.extract_strided_slice %17 {offsets = [0, 0], sizes = [8, 128], strides = [1, 1]} : vector<8x256xf32> to vector<8x128xf32>
    %20 = arith.addf %18, %19 : vector<8x128xf32>
    %21 = vector.extract_strided_slice %20 {offsets = [0, 0], sizes = [8, 96], strides = [1, 1]} : vector<8x128xf32> to vector<8x96xf32>
    %22 = arith.negf %21 : vector<8x96xf32>
    %23 = math.exp %22 : vector<8x96xf32>
    %cst_23 = arith.constant 1.000000e+00 : f32
    %24 = vector.broadcast %cst_23 : f32 to vector<8x96xf32>
    %25 = arith.addf %24, %23 : vector<8x96xf32>
    %26 = arith.divf %24, %25 : vector<8x96xf32>
    %27 = vector.extract_strided_slice %20 {offsets = [0, 96], sizes = [8, 32], strides = [1, 1]} : vector<8x128xf32> to vector<8x32xf32>
    %28 = math.tanh %27 : vector<8x32xf32>
    %29 = vector.extract_strided_slice %26 {offsets = [0, 0], sizes = [8, 32], strides = [1, 1]} : vector<8x96xf32> to vector<8x32xf32>
    %30 = vector.extract_strided_slice %26 {offsets = [0, 32], sizes = [8, 32], strides = [1, 1]} : vector<8x96xf32> to vector<8x32xf32>
    %31 = vector.extract_strided_slice %26 {offsets = [0, 64], sizes = [8, 32], strides = [1, 1]} : vector<8x96xf32> to vector<8x32xf32>
    %32 = arith.mulf %30, %13 : vector<8x32xf32>
    %33 = arith.mulf %29, %28 : vector<8x32xf32>
    %34 = arith.addf %32, %33 : vector<8x32xf32>
    %35 = math.tanh %34 : vector<8x32xf32>
    %36 = arith.mulf %31, %35 : vector<8x32xf32>
    %c1_i32 = arith.constant 1 : i32
    %37 = arith.truncf %36 : vector<8x32xf32> to vector<8x32xbf16>
    %cst_24 = arith.constant dense<0.000000e+00> : vector<8x256xf32>
    %38 = tpu.matmul %37, %7, %cst_24 {dimension_numbers = #tpu.dot_dimension_numbers<[1], [0], [0], [1], [0, 0, 1, 1], [], []>} : vector<8x32xbf16>, vector<32x256xbf16>, vector<8x256xf32> -> vector<8x256xf32>
    %39 = arith.truncf %14 : vector<8x32xf32> to vector<8x32xbf16>
    %cst_25 = arith.constant dense<0.000000e+00> : vector<8x128xf32>
    %40 = tpu.matmul %39, %8, %cst_25 {dimension_numbers = #tpu.dot_dimension_numbers<[1], [0], [0], [1], [0, 0, 1, 1], [], []>} : vector<8x32xbf16>, vector<32x128xbf16>, vector<8x128xf32> -> vector<8x128xf32>
    %41 = vector.extract_strided_slice %38 {offsets = [0, 128], sizes = [8, 128], strides = [1, 1]} : vector<8x256xf32> to vector<8x128xf32>
    %42 = arith.addf %41, %40 : vector<8x128xf32>
    %43 = arith.addf %42, %11 : vector<8x128xf32>
    %44 = vector.extract_strided_slice %43 {offsets = [0, 0], sizes = [8, 96], strides = [1, 1]} : vector<8x128xf32> to vector<8x96xf32>
    %45 = arith.negf %44 : vector<8x96xf32>
    %46 = math.exp %45 : vector<8x96xf32>
    %cst_26 = arith.constant 1.000000e+00 : f32
    %47 = vector.broadcast %cst_26 : f32 to vector<8x96xf32>
    %48 = arith.addf %47, %46 : vector<8x96xf32>
    %49 = arith.divf %47, %48 : vector<8x96xf32>
    %50 = vector.extract_strided_slice %43 {offsets = [0, 96], sizes = [8, 32], strides = [1, 1]} : vector<8x128xf32> to vector<8x32xf32>
    %51 = math.tanh %50 : vector<8x32xf32>
    %52 = vector.extract_strided_slice %49 {offsets = [0, 0], sizes = [8, 32], strides = [1, 1]} : vector<8x96xf32> to vector<8x32xf32>
    %53 = vector.extract_strided_slice %49 {offsets = [0, 32], sizes = [8, 32], strides = [1, 1]} : vector<8x96xf32> to vector<8x32xf32>
    %54 = vector.extract_strided_slice %49 {offsets = [0, 64], sizes = [8, 32], strides = [1, 1]} : vector<8x96xf32> to vector<8x32xf32>
    %55 = arith.mulf %53, %15 : vector<8x32xf32>
    %56 = arith.mulf %52, %51 : vector<8x32xf32>
    %57 = arith.addf %55, %56 : vector<8x32xf32>
    %58 = math.tanh %57 : vector<8x32xf32>
    %59 = arith.mulf %54, %58 : vector<8x32xf32>
    %c8_i32 = arith.constant 8 : i32
    %60 = arith.muli %c1_i32, %c8_i32 : i32
    %61 = tpu.assume_multiple %60, 8 : i32
    %62 = arith.index_cast %61 : i32 to index
    %c0_27 = arith.constant 0 : index
    %63 = vector.load %arg9[%62, %c0_27] : memref<64x128xf32, #tpu.memory_space<vmem>>, vector<8x128xf32>
    %64 = vector.extract_strided_slice %38 {offsets = [0, 0], sizes = [8, 128], strides = [1, 1]} : vector<8x256xf32> to vector<8x128xf32>
    %65 = arith.addf %63, %64 : vector<8x128xf32>
    %66 = vector.extract_strided_slice %65 {offsets = [0, 0], sizes = [8, 96], strides = [1, 1]} : vector<8x128xf32> to vector<8x96xf32>
    %67 = arith.negf %66 : vector<8x96xf32>
    %68 = math.exp %67 : vector<8x96xf32>
    %cst_28 = arith.constant 1.000000e+00 : f32
    %69 = vector.broadcast %cst_28 : f32 to vector<8x96xf32>
    %70 = arith.addf %69, %68 : vector<8x96xf32>
    %71 = arith.divf %69, %70 : vector<8x96xf32>
    %72 = vector.extract_strided_slice %65 {offsets = [0, 96], sizes = [8, 32], strides = [1, 1]} : vector<8x128xf32> to vector<8x32xf32>
    %73 = math.tanh %72 : vector<8x32xf32>
    %74 = vector.extract_strided_slice %71 {offsets = [0, 0], sizes = [8, 32], strides = [1, 1]} : vector<8x96xf32> to vector<8x32xf32>
    %75 = vector.extract_strided_slice %71 {offsets = [0, 32], sizes = [8, 32], strides = [1, 1]} : vector<8x96xf32> to vector<8x32xf32>
    %76 = vector.extract_strided_slice %71 {offsets = [0, 64], sizes = [8, 32], strides = [1, 1]} : vector<8x96xf32> to vector<8x32xf32>
    %77 = arith.mulf %75, %34 : vector<8x32xf32>
    %78 = arith.mulf %74, %73 : vector<8x32xf32>
    %79 = arith.addf %77, %78 : vector<8x32xf32>
    %80 = math.tanh %79 : vector<8x32xf32>
    %81 = arith.mulf %76, %80 : vector<8x32xf32>
    %c2_i32 = arith.constant 2 : i32
    %82 = arith.truncf %81 : vector<8x32xf32> to vector<8x32xbf16>
    %cst_29 = arith.constant dense<0.000000e+00> : vector<8x256xf32>
    %83 = tpu.matmul %82, %7, %cst_29 {dimension_numbers = #tpu.dot_dimension_numbers<[1], [0], [0], [1], [0, 0, 1, 1], [], []>} : vector<8x32xbf16>, vector<32x256xbf16>, vector<8x256xf32> -> vector<8x256xf32>
    %84 = arith.truncf %59 : vector<8x32xf32> to vector<8x32xbf16>
    %cst_30 = arith.constant dense<0.000000e+00> : vector<8x128xf32>
    %85 = tpu.matmul %84, %8, %cst_30 {dimension_numbers = #tpu.dot_dimension_numbers<[1], [0], [0], [1], [0, 0, 1, 1], [], []>} : vector<8x32xbf16>, vector<32x128xbf16>, vector<8x128xf32> -> vector<8x128xf32>
    %86 = vector.extract_strided_slice %83 {offsets = [0, 128], sizes = [8, 128], strides = [1, 1]} : vector<8x256xf32> to vector<8x128xf32>
    %87 = arith.addf %86, %85 : vector<8x128xf32>
    %88 = arith.addf %87, %11 : vector<8x128xf32>
    %89 = vector.extract_strided_slice %88 {offsets = [0, 0], sizes = [8, 96], strides = [1, 1]} : vector<8x128xf32> to vector<8x96xf32>
    %90 = arith.negf %89 : vector<8x96xf32>
    %91 = math.exp %90 : vector<8x96xf32>
    %cst_31 = arith.constant 1.000000e+00 : f32
    %92 = vector.broadcast %cst_31 : f32 to vector<8x96xf32>
    %93 = arith.addf %92, %91 : vector<8x96xf32>
    %94 = arith.divf %92, %93 : vector<8x96xf32>
    %95 = vector.extract_strided_slice %88 {offsets = [0, 96], sizes = [8, 32], strides = [1, 1]} : vector<8x128xf32> to vector<8x32xf32>
    %96 = math.tanh %95 : vector<8x32xf32>
    %97 = vector.extract_strided_slice %94 {offsets = [0, 0], sizes = [8, 32], strides = [1, 1]} : vector<8x96xf32> to vector<8x32xf32>
    %98 = vector.extract_strided_slice %94 {offsets = [0, 32], sizes = [8, 32], strides = [1, 1]} : vector<8x96xf32> to vector<8x32xf32>
    %99 = vector.extract_strided_slice %94 {offsets = [0, 64], sizes = [8, 32], strides = [1, 1]} : vector<8x96xf32> to vector<8x32xf32>
    %100 = arith.mulf %98, %57 : vector<8x32xf32>
    %101 = arith.mulf %97, %96 : vector<8x32xf32>
    %102 = arith.addf %100, %101 : vector<8x32xf32>
    %103 = math.tanh %102 : vector<8x32xf32>
    %104 = arith.mulf %99, %103 : vector<8x32xf32>
    %c8_i32_32 = arith.constant 8 : i32
    %105 = arith.muli %c2_i32, %c8_i32_32 : i32
    %106 = tpu.assume_multiple %105, 8 : i32
    %107 = arith.index_cast %106 : i32 to index
    %c0_33 = arith.constant 0 : index
    %108 = vector.load %arg9[%107, %c0_33] : memref<64x128xf32, #tpu.memory_space<vmem>>, vector<8x128xf32>
    %109 = vector.extract_strided_slice %83 {offsets = [0, 0], sizes = [8, 128], strides = [1, 1]} : vector<8x256xf32> to vector<8x128xf32>
    %110 = arith.addf %108, %109 : vector<8x128xf32>
    %111 = vector.extract_strided_slice %110 {offsets = [0, 0], sizes = [8, 96], strides = [1, 1]} : vector<8x128xf32> to vector<8x96xf32>
    %112 = arith.negf %111 : vector<8x96xf32>
    %113 = math.exp %112 : vector<8x96xf32>
    %cst_34 = arith.constant 1.000000e+00 : f32
    %114 = vector.broadcast %cst_34 : f32 to vector<8x96xf32>
    %115 = arith.addf %114, %113 : vector<8x96xf32>
    %116 = arith.divf %114, %115 : vector<8x96xf32>
    %117 = vector.extract_strided_slice %110 {offsets = [0, 96], sizes = [8, 32], strides = [1, 1]} : vector<8x128xf32> to vector<8x32xf32>
    %118 = math.tanh %117 : vector<8x32xf32>
    %119 = vector.extract_strided_slice %116 {offsets = [0, 0], sizes = [8, 32], strides = [1, 1]} : vector<8x96xf32> to vector<8x32xf32>
    %120 = vector.extract_strided_slice %116 {offsets = [0, 32], sizes = [8, 32], strides = [1, 1]} : vector<8x96xf32> to vector<8x32xf32>
    %121 = vector.extract_strided_slice %116 {offsets = [0, 64], sizes = [8, 32], strides = [1, 1]} : vector<8x96xf32> to vector<8x32xf32>
    %122 = arith.mulf %120, %79 : vector<8x32xf32>
    %123 = arith.mulf %119, %118 : vector<8x32xf32>
    %124 = arith.addf %122, %123 : vector<8x32xf32>
    %125 = math.tanh %124 : vector<8x32xf32>
    %126 = arith.mulf %121, %125 : vector<8x32xf32>
    %c3_i32 = arith.constant 3 : i32
    %127 = arith.truncf %126 : vector<8x32xf32> to vector<8x32xbf16>
    %cst_35 = arith.constant dense<0.000000e+00> : vector<8x256xf32>
    %128 = tpu.matmul %127, %7, %cst_35 {dimension_numbers = #tpu.dot_dimension_numbers<[1], [0], [0], [1], [0, 0, 1, 1], [], []>} : vector<8x32xbf16>, vector<32x256xbf16>, vector<8x256xf32> -> vector<8x256xf32>
    %129 = arith.truncf %104 : vector<8x32xf32> to vector<8x32xbf16>
    %cst_36 = arith.constant dense<0.000000e+00> : vector<8x128xf32>
    %130 = tpu.matmul %129, %8, %cst_36 {dimension_numbers = #tpu.dot_dimension_numbers<[1], [0], [0], [1], [0, 0, 1, 1], [], []>} : vector<8x32xbf16>, vector<32x128xbf16>, vector<8x128xf32> -> vector<8x128xf32>
    %131 = vector.extract_strided_slice %128 {offsets = [0, 128], sizes = [8, 128], strides = [1, 1]} : vector<8x256xf32> to vector<8x128xf32>
    %132 = arith.addf %131, %130 : vector<8x128xf32>
    %133 = arith.addf %132, %11 : vector<8x128xf32>
    %134 = vector.extract_strided_slice %133 {offsets = [0, 0], sizes = [8, 96], strides = [1, 1]} : vector<8x128xf32> to vector<8x96xf32>
    %135 = arith.negf %134 : vector<8x96xf32>
    %136 = math.exp %135 : vector<8x96xf32>
    %cst_37 = arith.constant 1.000000e+00 : f32
    %137 = vector.broadcast %cst_37 : f32 to vector<8x96xf32>
    %138 = arith.addf %137, %136 : vector<8x96xf32>
    %139 = arith.divf %137, %138 : vector<8x96xf32>
    %140 = vector.extract_strided_slice %133 {offsets = [0, 96], sizes = [8, 32], strides = [1, 1]} : vector<8x128xf32> to vector<8x32xf32>
    %141 = math.tanh %140 : vector<8x32xf32>
    %142 = vector.extract_strided_slice %139 {offsets = [0, 0], sizes = [8, 32], strides = [1, 1]} : vector<8x96xf32> to vector<8x32xf32>
    %143 = vector.extract_strided_slice %139 {offsets = [0, 32], sizes = [8, 32], strides = [1, 1]} : vector<8x96xf32> to vector<8x32xf32>
    %144 = vector.extract_strided_slice %139 {offsets = [0, 64], sizes = [8, 32], strides = [1, 1]} : vector<8x96xf32> to vector<8x32xf32>
    %145 = arith.mulf %143, %102 : vector<8x32xf32>
    %146 = arith.mulf %142, %141 : vector<8x32xf32>
    %147 = arith.addf %145, %146 : vector<8x32xf32>
    %148 = math.tanh %147 : vector<8x32xf32>
    %149 = arith.mulf %144, %148 : vector<8x32xf32>
    %c8_i32_38 = arith.constant 8 : i32
    %150 = arith.muli %c3_i32, %c8_i32_38 : i32
    %151 = tpu.assume_multiple %150, 8 : i32
    %152 = arith.index_cast %151 : i32 to index
    %c0_39 = arith.constant 0 : index
    %153 = vector.load %arg9[%152, %c0_39] : memref<64x128xf32, #tpu.memory_space<vmem>>, vector<8x128xf32>
    %154 = vector.extract_strided_slice %128 {offsets = [0, 0], sizes = [8, 128], strides = [1, 1]} : vector<8x256xf32> to vector<8x128xf32>
    %155 = arith.addf %153, %154 : vector<8x128xf32>
    %156 = vector.extract_strided_slice %155 {offsets = [0, 0], sizes = [8, 96], strides = [1, 1]} : vector<8x128xf32> to vector<8x96xf32>
    %157 = arith.negf %156 : vector<8x96xf32>
    %158 = math.exp %157 : vector<8x96xf32>
    %cst_40 = arith.constant 1.000000e+00 : f32
    %159 = vector.broadcast %cst_40 : f32 to vector<8x96xf32>
    %160 = arith.addf %159, %158 : vector<8x96xf32>
    %161 = arith.divf %159, %160 : vector<8x96xf32>
    %162 = vector.extract_strided_slice %155 {offsets = [0, 96], sizes = [8, 32], strides = [1, 1]} : vector<8x128xf32> to vector<8x32xf32>
    %163 = math.tanh %162 : vector<8x32xf32>
    %164 = vector.extract_strided_slice %161 {offsets = [0, 0], sizes = [8, 32], strides = [1, 1]} : vector<8x96xf32> to vector<8x32xf32>
    %165 = vector.extract_strided_slice %161 {offsets = [0, 32], sizes = [8, 32], strides = [1, 1]} : vector<8x96xf32> to vector<8x32xf32>
    %166 = vector.extract_strided_slice %161 {offsets = [0, 64], sizes = [8, 32], strides = [1, 1]} : vector<8x96xf32> to vector<8x32xf32>
    %167 = arith.mulf %165, %124 : vector<8x32xf32>
    %168 = arith.mulf %164, %163 : vector<8x32xf32>
    %169 = arith.addf %167, %168 : vector<8x32xf32>
    %170 = math.tanh %169 : vector<8x32xf32>
    %171 = arith.mulf %166, %170 : vector<8x32xf32>
    %c4_i32 = arith.constant 4 : i32
    %172 = arith.truncf %171 : vector<8x32xf32> to vector<8x32xbf16>
    %cst_41 = arith.constant dense<0.000000e+00> : vector<8x256xf32>
    %173 = tpu.matmul %172, %7, %cst_41 {dimension_numbers = #tpu.dot_dimension_numbers<[1], [0], [0], [1], [0, 0, 1, 1], [], []>} : vector<8x32xbf16>, vector<32x256xbf16>, vector<8x256xf32> -> vector<8x256xf32>
    %174 = arith.truncf %149 : vector<8x32xf32> to vector<8x32xbf16>
    %cst_42 = arith.constant dense<0.000000e+00> : vector<8x128xf32>
    %175 = tpu.matmul %174, %8, %cst_42 {dimension_numbers = #tpu.dot_dimension_numbers<[1], [0], [0], [1], [0, 0, 1, 1], [], []>} : vector<8x32xbf16>, vector<32x128xbf16>, vector<8x128xf32> -> vector<8x128xf32>
    %176 = vector.extract_strided_slice %173 {offsets = [0, 128], sizes = [8, 128], strides = [1, 1]} : vector<8x256xf32> to vector<8x128xf32>
    %177 = arith.addf %176, %175 : vector<8x128xf32>
    %178 = arith.addf %177, %11 : vector<8x128xf32>
    %179 = vector.extract_strided_slice %178 {offsets = [0, 0], sizes = [8, 96], strides = [1, 1]} : vector<8x128xf32> to vector<8x96xf32>
    %180 = arith.negf %179 : vector<8x96xf32>
    %181 = math.exp %180 : vector<8x96xf32>
    %cst_43 = arith.constant 1.000000e+00 : f32
    %182 = vector.broadcast %cst_43 : f32 to vector<8x96xf32>
    %183 = arith.addf %182, %181 : vector<8x96xf32>
    %184 = arith.divf %182, %183 : vector<8x96xf32>
    %185 = vector.extract_strided_slice %178 {offsets = [0, 96], sizes = [8, 32], strides = [1, 1]} : vector<8x128xf32> to vector<8x32xf32>
    %186 = math.tanh %185 : vector<8x32xf32>
    %187 = vector.extract_strided_slice %184 {offsets = [0, 0], sizes = [8, 32], strides = [1, 1]} : vector<8x96xf32> to vector<8x32xf32>
    %188 = vector.extract_strided_slice %184 {offsets = [0, 32], sizes = [8, 32], strides = [1, 1]} : vector<8x96xf32> to vector<8x32xf32>
    %189 = vector.extract_strided_slice %184 {offsets = [0, 64], sizes = [8, 32], strides = [1, 1]} : vector<8x96xf32> to vector<8x32xf32>
    %190 = arith.mulf %188, %147 : vector<8x32xf32>
    %191 = arith.mulf %187, %186 : vector<8x32xf32>
    %192 = arith.addf %190, %191 : vector<8x32xf32>
    %193 = math.tanh %192 : vector<8x32xf32>
    %194 = arith.mulf %189, %193 : vector<8x32xf32>
    %c8_i32_44 = arith.constant 8 : i32
    %195 = arith.muli %c4_i32, %c8_i32_44 : i32
    %196 = tpu.assume_multiple %195, 8 : i32
    %197 = arith.index_cast %196 : i32 to index
    %c0_45 = arith.constant 0 : index
    %198 = vector.load %arg9[%197, %c0_45] : memref<64x128xf32, #tpu.memory_space<vmem>>, vector<8x128xf32>
    %199 = vector.extract_strided_slice %173 {offsets = [0, 0], sizes = [8, 128], strides = [1, 1]} : vector<8x256xf32> to vector<8x128xf32>
    %200 = arith.addf %198, %199 : vector<8x128xf32>
    %201 = vector.extract_strided_slice %200 {offsets = [0, 0], sizes = [8, 96], strides = [1, 1]} : vector<8x128xf32> to vector<8x96xf32>
    %202 = arith.negf %201 : vector<8x96xf32>
    %203 = math.exp %202 : vector<8x96xf32>
    %cst_46 = arith.constant 1.000000e+00 : f32
    %204 = vector.broadcast %cst_46 : f32 to vector<8x96xf32>
    %205 = arith.addf %204, %203 : vector<8x96xf32>
    %206 = arith.divf %204, %205 : vector<8x96xf32>
    %207 = vector.extract_strided_slice %200 {offsets = [0, 96], sizes = [8, 32], strides = [1, 1]} : vector<8x128xf32> to vector<8x32xf32>
    %208 = math.tanh %207 : vector<8x32xf32>
    %209 = vector.extract_strided_slice %206 {offsets = [0, 0], sizes = [8, 32], strides = [1, 1]} : vector<8x96xf32> to vector<8x32xf32>
    %210 = vector.extract_strided_slice %206 {offsets = [0, 32], sizes = [8, 32], strides = [1, 1]} : vector<8x96xf32> to vector<8x32xf32>
    %211 = vector.extract_strided_slice %206 {offsets = [0, 64], sizes = [8, 32], strides = [1, 1]} : vector<8x96xf32> to vector<8x32xf32>
    %212 = arith.mulf %210, %169 : vector<8x32xf32>
    %213 = arith.mulf %209, %208 : vector<8x32xf32>
    %214 = arith.addf %212, %213 : vector<8x32xf32>
    %215 = math.tanh %214 : vector<8x32xf32>
    %216 = arith.mulf %211, %215 : vector<8x32xf32>
    %c5_i32 = arith.constant 5 : i32
    %217 = arith.truncf %216 : vector<8x32xf32> to vector<8x32xbf16>
    %cst_47 = arith.constant dense<0.000000e+00> : vector<8x256xf32>
    %218 = tpu.matmul %217, %7, %cst_47 {dimension_numbers = #tpu.dot_dimension_numbers<[1], [0], [0], [1], [0, 0, 1, 1], [], []>} : vector<8x32xbf16>, vector<32x256xbf16>, vector<8x256xf32> -> vector<8x256xf32>
    %219 = arith.truncf %194 : vector<8x32xf32> to vector<8x32xbf16>
    %cst_48 = arith.constant dense<0.000000e+00> : vector<8x128xf32>
    %220 = tpu.matmul %219, %8, %cst_48 {dimension_numbers = #tpu.dot_dimension_numbers<[1], [0], [0], [1], [0, 0, 1, 1], [], []>} : vector<8x32xbf16>, vector<32x128xbf16>, vector<8x128xf32> -> vector<8x128xf32>
    %221 = vector.extract_strided_slice %218 {offsets = [0, 128], sizes = [8, 128], strides = [1, 1]} : vector<8x256xf32> to vector<8x128xf32>
    %222 = arith.addf %221, %220 : vector<8x128xf32>
    %223 = arith.addf %222, %11 : vector<8x128xf32>
    %224 = vector.extract_strided_slice %223 {offsets = [0, 0], sizes = [8, 96], strides = [1, 1]} : vector<8x128xf32> to vector<8x96xf32>
    %225 = arith.negf %224 : vector<8x96xf32>
    %226 = math.exp %225 : vector<8x96xf32>
    %cst_49 = arith.constant 1.000000e+00 : f32
    %227 = vector.broadcast %cst_49 : f32 to vector<8x96xf32>
    %228 = arith.addf %227, %226 : vector<8x96xf32>
    %229 = arith.divf %227, %228 : vector<8x96xf32>
    %230 = vector.extract_strided_slice %223 {offsets = [0, 96], sizes = [8, 32], strides = [1, 1]} : vector<8x128xf32> to vector<8x32xf32>
    %231 = math.tanh %230 : vector<8x32xf32>
    %232 = vector.extract_strided_slice %229 {offsets = [0, 0], sizes = [8, 32], strides = [1, 1]} : vector<8x96xf32> to vector<8x32xf32>
    %233 = vector.extract_strided_slice %229 {offsets = [0, 32], sizes = [8, 32], strides = [1, 1]} : vector<8x96xf32> to vector<8x32xf32>
    %234 = vector.extract_strided_slice %229 {offsets = [0, 64], sizes = [8, 32], strides = [1, 1]} : vector<8x96xf32> to vector<8x32xf32>
    %235 = arith.mulf %233, %192 : vector<8x32xf32>
    %236 = arith.mulf %232, %231 : vector<8x32xf32>
    %237 = arith.addf %235, %236 : vector<8x32xf32>
    %238 = math.tanh %237 : vector<8x32xf32>
    %239 = arith.mulf %234, %238 : vector<8x32xf32>
    %c8_i32_50 = arith.constant 8 : i32
    %240 = arith.muli %c5_i32, %c8_i32_50 : i32
    %241 = tpu.assume_multiple %240, 8 : i32
    %242 = arith.index_cast %241 : i32 to index
    %c0_51 = arith.constant 0 : index
    %243 = vector.load %arg9[%242, %c0_51] : memref<64x128xf32, #tpu.memory_space<vmem>>, vector<8x128xf32>
    %244 = vector.extract_strided_slice %218 {offsets = [0, 0], sizes = [8, 128], strides = [1, 1]} : vector<8x256xf32> to vector<8x128xf32>
    %245 = arith.addf %243, %244 : vector<8x128xf32>
    %246 = vector.extract_strided_slice %245 {offsets = [0, 0], sizes = [8, 96], strides = [1, 1]} : vector<8x128xf32> to vector<8x96xf32>
    %247 = arith.negf %246 : vector<8x96xf32>
    %248 = math.exp %247 : vector<8x96xf32>
    %cst_52 = arith.constant 1.000000e+00 : f32
    %249 = vector.broadcast %cst_52 : f32 to vector<8x96xf32>
    %250 = arith.addf %249, %248 : vector<8x96xf32>
    %251 = arith.divf %249, %250 : vector<8x96xf32>
    %252 = vector.extract_strided_slice %245 {offsets = [0, 96], sizes = [8, 32], strides = [1, 1]} : vector<8x128xf32> to vector<8x32xf32>
    %253 = math.tanh %252 : vector<8x32xf32>
    %254 = vector.extract_strided_slice %251 {offsets = [0, 0], sizes = [8, 32], strides = [1, 1]} : vector<8x96xf32> to vector<8x32xf32>
    %255 = vector.extract_strided_slice %251 {offsets = [0, 32], sizes = [8, 32], strides = [1, 1]} : vector<8x96xf32> to vector<8x32xf32>
    %256 = vector.extract_strided_slice %251 {offsets = [0, 64], sizes = [8, 32], strides = [1, 1]} : vector<8x96xf32> to vector<8x32xf32>
    %257 = arith.mulf %255, %214 : vector<8x32xf32>
    %258 = arith.mulf %254, %253 : vector<8x32xf32>
    %259 = arith.addf %257, %258 : vector<8x32xf32>
    %260 = math.tanh %259 : vector<8x32xf32>
    %261 = arith.mulf %256, %260 : vector<8x32xf32>
    %c6_i32 = arith.constant 6 : i32
    %262 = arith.truncf %261 : vector<8x32xf32> to vector<8x32xbf16>
    %cst_53 = arith.constant dense<0.000000e+00> : vector<8x256xf32>
    %263 = tpu.matmul %262, %7, %cst_53 {dimension_numbers = #tpu.dot_dimension_numbers<[1], [0], [0], [1], [0, 0, 1, 1], [], []>} : vector<8x32xbf16>, vector<32x256xbf16>, vector<8x256xf32> -> vector<8x256xf32>
    %264 = arith.truncf %239 : vector<8x32xf32> to vector<8x32xbf16>
    %cst_54 = arith.constant dense<0.000000e+00> : vector<8x128xf32>
    %265 = tpu.matmul %264, %8, %cst_54 {dimension_numbers = #tpu.dot_dimension_numbers<[1], [0], [0], [1], [0, 0, 1, 1], [], []>} : vector<8x32xbf16>, vector<32x128xbf16>, vector<8x128xf32> -> vector<8x128xf32>
    %266 = vector.extract_strided_slice %263 {offsets = [0, 128], sizes = [8, 128], strides = [1, 1]} : vector<8x256xf32> to vector<8x128xf32>
    %267 = arith.addf %266, %265 : vector<8x128xf32>
    %268 = arith.addf %267, %11 : vector<8x128xf32>
    %269 = vector.extract_strided_slice %268 {offsets = [0, 0], sizes = [8, 96], strides = [1, 1]} : vector<8x128xf32> to vector<8x96xf32>
    %270 = arith.negf %269 : vector<8x96xf32>
    %271 = math.exp %270 : vector<8x96xf32>
    %cst_55 = arith.constant 1.000000e+00 : f32
    %272 = vector.broadcast %cst_55 : f32 to vector<8x96xf32>
    %273 = arith.addf %272, %271 : vector<8x96xf32>
    %274 = arith.divf %272, %273 : vector<8x96xf32>
    %275 = vector.extract_strided_slice %268 {offsets = [0, 96], sizes = [8, 32], strides = [1, 1]} : vector<8x128xf32> to vector<8x32xf32>
    %276 = math.tanh %275 : vector<8x32xf32>
    %277 = vector.extract_strided_slice %274 {offsets = [0, 0], sizes = [8, 32], strides = [1, 1]} : vector<8x96xf32> to vector<8x32xf32>
    %278 = vector.extract_strided_slice %274 {offsets = [0, 32], sizes = [8, 32], strides = [1, 1]} : vector<8x96xf32> to vector<8x32xf32>
    %279 = vector.extract_strided_slice %274 {offsets = [0, 64], sizes = [8, 32], strides = [1, 1]} : vector<8x96xf32> to vector<8x32xf32>
    %280 = arith.mulf %278, %237 : vector<8x32xf32>
    %281 = arith.mulf %277, %276 : vector<8x32xf32>
    %282 = arith.addf %280, %281 : vector<8x32xf32>
    %283 = math.tanh %282 : vector<8x32xf32>
    %284 = arith.mulf %279, %283 : vector<8x32xf32>
    %c8_i32_56 = arith.constant 8 : i32
    %285 = arith.muli %c6_i32, %c8_i32_56 : i32
    %286 = tpu.assume_multiple %285, 8 : i32
    %287 = arith.index_cast %286 : i32 to index
    %c0_57 = arith.constant 0 : index
    %288 = vector.load %arg9[%287, %c0_57] : memref<64x128xf32, #tpu.memory_space<vmem>>, vector<8x128xf32>
    %289 = vector.extract_strided_slice %263 {offsets = [0, 0], sizes = [8, 128], strides = [1, 1]} : vector<8x256xf32> to vector<8x128xf32>
    %290 = arith.addf %288, %289 : vector<8x128xf32>
    %291 = vector.extract_strided_slice %290 {offsets = [0, 0], sizes = [8, 96], strides = [1, 1]} : vector<8x128xf32> to vector<8x96xf32>
    %292 = arith.negf %291 : vector<8x96xf32>
    %293 = math.exp %292 : vector<8x96xf32>
    %cst_58 = arith.constant 1.000000e+00 : f32
    %294 = vector.broadcast %cst_58 : f32 to vector<8x96xf32>
    %295 = arith.addf %294, %293 : vector<8x96xf32>
    %296 = arith.divf %294, %295 : vector<8x96xf32>
    %297 = vector.extract_strided_slice %290 {offsets = [0, 96], sizes = [8, 32], strides = [1, 1]} : vector<8x128xf32> to vector<8x32xf32>
    %298 = math.tanh %297 : vector<8x32xf32>
    %299 = vector.extract_strided_slice %296 {offsets = [0, 0], sizes = [8, 32], strides = [1, 1]} : vector<8x96xf32> to vector<8x32xf32>
    %300 = vector.extract_strided_slice %296 {offsets = [0, 32], sizes = [8, 32], strides = [1, 1]} : vector<8x96xf32> to vector<8x32xf32>
    %301 = vector.extract_strided_slice %296 {offsets = [0, 64], sizes = [8, 32], strides = [1, 1]} : vector<8x96xf32> to vector<8x32xf32>
    %302 = arith.mulf %300, %259 : vector<8x32xf32>
    %303 = arith.mulf %299, %298 : vector<8x32xf32>
    %304 = arith.addf %302, %303 : vector<8x32xf32>
    %305 = math.tanh %304 : vector<8x32xf32>
    %306 = arith.mulf %301, %305 : vector<8x32xf32>
    %c7_i32 = arith.constant 7 : i32
    %307 = arith.truncf %306 : vector<8x32xf32> to vector<8x32xbf16>
    %cst_59 = arith.constant dense<0.000000e+00> : vector<8x256xf32>
    %308 = tpu.matmul %307, %7, %cst_59 {dimension_numbers = #tpu.dot_dimension_numbers<[1], [0], [0], [1], [0, 0, 1, 1], [], []>} : vector<8x32xbf16>, vector<32x256xbf16>, vector<8x256xf32> -> vector<8x256xf32>
    %309 = arith.truncf %284 : vector<8x32xf32> to vector<8x32xbf16>
    %cst_60 = arith.constant dense<0.000000e+00> : vector<8x128xf32>
    %310 = tpu.matmul %309, %8, %cst_60 {dimension_numbers = #tpu.dot_dimension_numbers<[1], [0], [0], [1], [0, 0, 1, 1], [], []>} : vector<8x32xbf16>, vector<32x128xbf16>, vector<8x128xf32> -> vector<8x128xf32>
    %311 = vector.extract_strided_slice %308 {offsets = [0, 128], sizes = [8, 128], strides = [1, 1]} : vector<8x256xf32> to vector<8x128xf32>
    %312 = arith.addf %311, %310 : vector<8x128xf32>
    %313 = arith.addf %312, %11 : vector<8x128xf32>
    %314 = vector.extract_strided_slice %313 {offsets = [0, 0], sizes = [8, 96], strides = [1, 1]} : vector<8x128xf32> to vector<8x96xf32>
    %315 = arith.negf %314 : vector<8x96xf32>
    %316 = math.exp %315 : vector<8x96xf32>
    %cst_61 = arith.constant 1.000000e+00 : f32
    %317 = vector.broadcast %cst_61 : f32 to vector<8x96xf32>
    %318 = arith.addf %317, %316 : vector<8x96xf32>
    %319 = arith.divf %317, %318 : vector<8x96xf32>
    %320 = vector.extract_strided_slice %313 {offsets = [0, 96], sizes = [8, 32], strides = [1, 1]} : vector<8x128xf32> to vector<8x32xf32>
    %321 = math.tanh %320 : vector<8x32xf32>
    %322 = vector.extract_strided_slice %319 {offsets = [0, 0], sizes = [8, 32], strides = [1, 1]} : vector<8x96xf32> to vector<8x32xf32>
    %323 = vector.extract_strided_slice %319 {offsets = [0, 32], sizes = [8, 32], strides = [1, 1]} : vector<8x96xf32> to vector<8x32xf32>
    %324 = vector.extract_strided_slice %319 {offsets = [0, 64], sizes = [8, 32], strides = [1, 1]} : vector<8x96xf32> to vector<8x32xf32>
    %325 = arith.mulf %323, %282 : vector<8x32xf32>
    %326 = arith.mulf %322, %321 : vector<8x32xf32>
    %327 = arith.addf %325, %326 : vector<8x32xf32>
    %328 = math.tanh %327 : vector<8x32xf32>
    %329 = arith.mulf %324, %328 : vector<8x32xf32>
    %c8_i32_62 = arith.constant 8 : i32
    %330 = arith.muli %c7_i32, %c8_i32_62 : i32
    %331 = tpu.assume_multiple %330, 8 : i32
    %332 = arith.index_cast %331 : i32 to index
    %c0_63 = arith.constant 0 : index
    %333 = vector.load %arg9[%332, %c0_63] : memref<64x128xf32, #tpu.memory_space<vmem>>, vector<8x128xf32>
    %334 = vector.extract_strided_slice %308 {offsets = [0, 0], sizes = [8, 128], strides = [1, 1]} : vector<8x256xf32> to vector<8x128xf32>
    %335 = arith.addf %333, %334 : vector<8x128xf32>
    %336 = vector.extract_strided_slice %335 {offsets = [0, 0], sizes = [8, 96], strides = [1, 1]} : vector<8x128xf32> to vector<8x96xf32>
    %337 = arith.negf %336 : vector<8x96xf32>
    %338 = math.exp %337 : vector<8x96xf32>
    %cst_64 = arith.constant 1.000000e+00 : f32
    %339 = vector.broadcast %cst_64 : f32 to vector<8x96xf32>
    %340 = arith.addf %339, %338 : vector<8x96xf32>
    %341 = arith.divf %339, %340 : vector<8x96xf32>
    %342 = vector.extract_strided_slice %335 {offsets = [0, 96], sizes = [8, 32], strides = [1, 1]} : vector<8x128xf32> to vector<8x32xf32>
    %343 = math.tanh %342 : vector<8x32xf32>
    %344 = vector.extract_strided_slice %341 {offsets = [0, 0], sizes = [8, 32], strides = [1, 1]} : vector<8x96xf32> to vector<8x32xf32>
    %345 = vector.extract_strided_slice %341 {offsets = [0, 32], sizes = [8, 32], strides = [1, 1]} : vector<8x96xf32> to vector<8x32xf32>
    %346 = vector.extract_strided_slice %341 {offsets = [0, 64], sizes = [8, 32], strides = [1, 1]} : vector<8x96xf32> to vector<8x32xf32>
    %347 = arith.mulf %345, %304 : vector<8x32xf32>
    %348 = arith.mulf %344, %343 : vector<8x32xf32>
    %349 = arith.addf %347, %348 : vector<8x32xf32>
    %350 = math.tanh %349 : vector<8x32xf32>
    %351 = arith.mulf %346, %350 : vector<8x32xf32>
    %c7_i32_65 = arith.constant 7 : i32
    %352 = arith.truncf %351 : vector<8x32xf32> to vector<8x32xbf16>
    %cst_66 = arith.constant dense<0.000000e+00> : vector<8x256xf32>
    %353 = tpu.matmul %352, %7, %cst_66 {dimension_numbers = #tpu.dot_dimension_numbers<[1], [0], [0], [1], [0, 0, 1, 1], [], []>} : vector<8x32xbf16>, vector<32x256xbf16>, vector<8x256xf32> -> vector<8x256xf32>
    %354 = arith.truncf %329 : vector<8x32xf32> to vector<8x32xbf16>
    %cst_67 = arith.constant dense<0.000000e+00> : vector<8x128xf32>
    %355 = tpu.matmul %354, %8, %cst_67 {dimension_numbers = #tpu.dot_dimension_numbers<[1], [0], [0], [1], [0, 0, 1, 1], [], []>} : vector<8x32xbf16>, vector<32x128xbf16>, vector<8x128xf32> -> vector<8x128xf32>
    %356 = vector.extract_strided_slice %353 {offsets = [0, 128], sizes = [8, 128], strides = [1, 1]} : vector<8x256xf32> to vector<8x128xf32>
    %357 = arith.addf %356, %355 : vector<8x128xf32>
    %358 = arith.addf %357, %11 : vector<8x128xf32>
    %359 = vector.extract_strided_slice %358 {offsets = [0, 0], sizes = [8, 96], strides = [1, 1]} : vector<8x128xf32> to vector<8x96xf32>
    %360 = arith.negf %359 : vector<8x96xf32>
    %361 = math.exp %360 : vector<8x96xf32>
    %cst_68 = arith.constant 1.000000e+00 : f32
    %362 = vector.broadcast %cst_68 : f32 to vector<8x96xf32>
    %363 = arith.addf %362, %361 : vector<8x96xf32>
    %364 = arith.divf %362, %363 : vector<8x96xf32>
    %365 = vector.extract_strided_slice %358 {offsets = [0, 96], sizes = [8, 32], strides = [1, 1]} : vector<8x128xf32> to vector<8x32xf32>
    %366 = math.tanh %365 : vector<8x32xf32>
    %367 = vector.extract_strided_slice %364 {offsets = [0, 0], sizes = [8, 32], strides = [1, 1]} : vector<8x96xf32> to vector<8x32xf32>
    %368 = vector.extract_strided_slice %364 {offsets = [0, 32], sizes = [8, 32], strides = [1, 1]} : vector<8x96xf32> to vector<8x32xf32>
    %369 = vector.extract_strided_slice %364 {offsets = [0, 64], sizes = [8, 32], strides = [1, 1]} : vector<8x96xf32> to vector<8x32xf32>
    %370 = arith.mulf %368, %327 : vector<8x32xf32>
    %371 = arith.mulf %367, %366 : vector<8x32xf32>
    %372 = arith.addf %370, %371 : vector<8x32xf32>
    %373 = math.tanh %372 : vector<8x32xf32>
    %374 = arith.mulf %369, %373 : vector<8x32xf32>
    %c0_69 = arith.constant 0 : index
    %c0_70 = arith.constant 0 : index
    %375 = vector.load %arg10[%c0_69, %c0_70] : memref<8x32xf32, #tpu.memory_space<vmem>>, vector<8x32xf32>
    tpu.vector_store %arg10[%c0_69, %c0_70], %351 {strides = array<i32>} : memref<8x32xf32, #tpu.memory_space<vmem>>, vector<8x32xf32>,
    %c0_71 = arith.constant 0 : index
    %c0_72 = arith.constant 0 : index
    %376 = vector.load %arg11[%c0_71, %c0_72] : memref<8x32xf32, #tpu.memory_space<vmem>>, vector<8x32xf32>
    tpu.vector_store %arg11[%c0_71, %c0_72], %349 {strides = array<i32>} : memref<8x32xf32, #tpu.memory_space<vmem>>, vector<8x32xf32>,
    %c0_73 = arith.constant 0 : index
    %c0_74 = arith.constant 0 : index
    %377 = vector.load %arg12[%c0_73, %c0_74] : memref<8x32xf32, #tpu.memory_space<vmem>>, vector<8x32xf32>
    tpu.vector_store %arg12[%c0_73, %c0_74], %374 {strides = array<i32>} : memref<8x32xf32, #tpu.memory_space<vmem>>, vector<8x32xf32>,
    %c0_75 = arith.constant 0 : index
    %c0_76 = arith.constant 0 : index
    %378 = vector.load %arg13[%c0_75, %c0_76] : memref<8x32xf32, #tpu.memory_space<vmem>>, vector<8x32xf32>
    tpu.vector_store %arg13[%c0_75, %c0_76], %372 {strides = array<i32>} : memref<8x32xf32, #tpu.memory_space<vmem>>, vector<8x32xf32>,
    %c0_i32_77 = arith.constant 0 : i32
    %379 = arith.cmpi eq, %arg0, %c0_i32_77 : i32
    %380 = arith.extui %379 : i1 to i32
    %c0_i32_78 = arith.constant 0 : i32
    %381 = arith.cmpi ne, %380, %c0_i32_78 : i32
    scf.if %381 {
      %382 = arith.truncf %374 : vector<8x32xf32> to vector<8x32xbf16>
      %c0_79 = arith.constant 0 : index
      %c0_80 = arith.constant 0 : index
      %383 = vector.load %arg6[%c0_79, %c0_80] : memref<32x8xbf16, #tpu.memory_space<vmem>>, vector<32x8xbf16>
      %cst_81 = arith.constant dense<0.000000e+00> : vector<8x8xf32>
      %384 = tpu.matmul %382, %383, %cst_81 {dimension_numbers = #tpu.dot_dimension_numbers<[1], [0], [0], [1], [0, 0, 1, 1], [], []>} : vector<8x32xbf16>, vector<32x8xbf16>, vector<8x8xf32> -> vector<8x8xf32>
      %c0_82 = arith.constant 0 : index
      %c0_83 = arith.constant 0 : index
      %385 = vector.load %arg7[%c0_82, %c0_83] : memref<1x8xf32, #tpu.memory_space<vmem>>, vector<1x8xf32>
      %386 = vector.broadcast %385 : vector<1x8xf32> to vector<8x8xf32>
      %387 = arith.addf %384, %386 : vector<8x8xf32>
      %c0_84 = arith.constant 0 : index
      %c0_85 = arith.constant 0 : index
      %388 = vector.load %arg8[%c0_84, %c0_85] : memref<8x8xf32, #tpu.memory_space<vmem>>, vector<8x8xf32>
      tpu.vector_store %arg8[%c0_84, %c0_85], %387 {strides = array<i32>} : memref<8x8xf32, #tpu.memory_space<vmem>>, vector<8x8xf32>,
    } else {
    }
    return
  }
  func.func @transform_0(%arg0: i32) -> (i32, i32) {
    %c0_i32 = arith.constant 0 : i32
    %c0_i32_0 = arith.constant 0 : i32
    return %arg0, %c0_i32 : i32, i32
  }
  func.func @transform_1(%arg0: i32) -> (i32, i32) {
    %c0_i32 = arith.constant 0 : i32
    %c0_i32_0 = arith.constant 0 : i32
    %c0_i32_1 = arith.constant 0 : i32
    return %c0_i32, %c0_i32_0 : i32, i32
  }
  func.func @transform_2(%arg0: i32) -> (i32, i32) {
    %c0_i32 = arith.constant 0 : i32
    %c0_i32_0 = arith.constant 0 : i32
    %c0_i32_1 = arith.constant 0 : i32
    return %c0_i32, %c0_i32_0 : i32, i32
  }
  func.func @transform_3(%arg0: i32) -> (i32, i32) {
    %c0_i32 = arith.constant 0 : i32
    %c0_i32_0 = arith.constant 0 : i32
    %c0_i32_1 = arith.constant 0 : i32
    return %c0_i32, %c0_i32_0 : i32, i32
  }
  func.func @transform_4(%arg0: i32) -> (i32, i32) {
    %c0_i32 = arith.constant 0 : i32
    %c0_i32_0 = arith.constant 0 : i32
    %c0_i32_1 = arith.constant 0 : i32
    return %c0_i32, %c0_i32_0 : i32, i32
  }
  func.func @transform_5(%arg0: i32) -> (i32, i32) {
    %c0_i32 = arith.constant 0 : i32
    %c0_i32_0 = arith.constant 0 : i32
    %c0_i32_1 = arith.constant 0 : i32
    return %c0_i32, %c0_i32_0 : i32, i32
  }
  func.func @transform_6(%arg0: i32) -> (i32, i32) {
    %c0_i32 = arith.constant 0 : i32
    %c0_i32_0 = arith.constant 0 : i32
    %c0_i32_1 = arith.constant 0 : i32
    return %c0_i32, %c0_i32_0 : i32, i32
  }
  func.func @transform_7(%arg0: i32) -> (i32, i32) {
    %c0_i32 = arith.constant 0 : i32
    %c0_i32_0 = arith.constant 0 : i32
    %c0_i32_1 = arith.constant 0 : i32
    return %c0_i32, %c0_i32_0 : i32, i32
  }
}

</mosaic_0001>

<bundles_post_ra>
// kernel: tpu_custom_call.1
= control target key start
LH: loop header
LB: loop body
LE: loop exit
PB: predicated region body
PF: predicated region fallthrough
CT: control target
= control target key end

     0   :  { %vm90_vm0 = vcmask 1040384   ;;  %vm77_vm1 = vcmask 138240   ;;  %v1910_v3 = vmov 0   ;;  %vm32_vm2 = vcmask 261120   ;;  %s2322_s0 = inlined_call_operand.vmem [shape: bf16[64,17], index: 0, kind: input, shape index: {}]   ;;  %s2323_s1 = inlined_call_operand.vmem [shape: bf16[17,128], index: 1, kind: input, shape index: {}]   ;;  %s2324_s2 = inlined_call_operand.vmem [shape: bf16[32,256], index: 2, kind: input, shape index: {}]   ;;  %s2325_s3 = inlined_call_operand.vmem [shape: bf16[32,128], index: 3, kind: input, shape index: {}]   ;;  %s2326_s4 = inlined_call_operand.vmem [shape: f32[1,128], index: 4, kind: input, shape index: {}]   ;;  %s2327_s5 = inlined_call_operand.vmem [shape: bf16[32,8], index: 5, kind: input, shape index: {}]   ;;  %s2328_s6 = inlined_call_operand.vmem [shape: f32[1,8], index: 6, kind: input, shape index: {}]   ;;  %s2329_s7 = inlined_call_operand.hbm [shape: f32[8,8], index: 7, kind: output, shape index: {}]  }
   0x1   :  { %v1739_v0 = vld [vmem:[%s2323_s1] sm:$0xff]   ;;  %v92_v4 = vsel %vm90_vm0, 65535, %v1910_v3  ;;  %245 = vmatprep.mubr.bf16.mxu1 %v1910_v3  ;;  %v1743_v5 = vld [vmem:[%s2323_s1 + $0x8] ss:$0 sps:$4 sm:$0x11]   ;;  %v1911_v11 = vmov 0.0  }
   0x2   :  { %v1963_v1 = vld [vmem:[%s2324_s2 + $0x4] ss:$8 sps:$4 sm:$0xff]   ;;  %1648 = vmatprep.subr.bf16.mxu0 %v1739_v0  ;;  %v1968_v2 = vld [vmem:[%s2324_s2] ss:$8 sps:$4 sm:$0xff]   ;;  %v1979_v6 = vld [vmem:[%s2324_s2 + $0x14] ss:$8 sps:$4 sm:$0xff]   ;;  %v94_v8 = vand.u32 %v1743_v5, %v92_v4 }
   0x3   :  { %213 = vmatprep.subr.bf16.mxu1 %v1963_v1  ;;  %1649 = vmatpush3.bf16.msra.mxu0 %v1739_v0  ;;  %v1985_v7 = vld [vmem:[%s2324_s2 + $0x10] ss:$8 sps:$4 sm:$0xff]   ;;  %v1747_v9 = vld [vmem:[%s2322_s0] sm:$0xff]   ;;  %v1748_v10 = vld [vmem:[%s2322_s0 + $0x8] sm:$0xff]   ;;  %33 = vst.msk [vmem:[#allocation3] sm:$0xff] %vm32_vm2, %v1911_v11 }
   0x4   :  { %214 = vmatpush1.bf16.msra.mxu1 %v1968_v2  ;;  %1650 = vmatprep.subr.bf16.mxu0 %v94_v8  ;;  %34 = vst.msk [vmem:[#allocation4] sm:$0xff] %vm32_vm2, %v1911_v11  ;;  %35 = vst.msk [vmem:[#allocation5] sm:$0xff] %vm32_vm2, %v1911_v11 }
   0x5   :  { %215 = vmatprep.subr.bf16.mxu1 %v1979_v6  ;;  %1652 = vmatprep.mubr.msk.bf16.mxu0 %vm77_vm1, %v1747_v9  ;;  %36 = vst.msk [vmem:[#allocation6] sm:$0xff] %vm32_vm2, %v1911_v11 }
   0x7   :  { %1651 = vmatpush3.bf16.msra.mxu0 %v94_v8 }
   0x8   :  { %216 = vmatpush1.bf16.msra.mxu1 %v1985_v7  ;;  %1660 = vmatprep.subr.bf16.mxu0 %v1911_v11 }
   0x9   :  { %290 = vmatprep.subr.bf16.mxu1 %v1963_v1 }
   0xa   :  { %12 = vsyncpa [#allocation8], 0  ;;  %1653 = vmatmul.mubr.msk.bf16.vlgmr.msra.gmra.mrb[0].mxu0 %vm77_vm1, %v1748_v10  ;;  %v184_v12 = vld [vmem:[#allocation3] sm:$0xff]  ;;  %s1912_s16 = smov 32   ;;  %v1750_v36 = vld [vmem:[%s2322_s0 + $0x10] sm:$0xff]   ;;  %vm1913_vm3 = vmmov 0  }
   0xb   :  { %v188_v13 = vpack.c.bf16 %v184_v12, %v184_v12  ;;  %v185_v24 = vld [vmem:[#allocation4] sm:$0xff]  ;;  %v2028_v35 = vld [vmem:[%s2325_s3] sm:$0xff]   ;;  %v1751_v37 = vld [vmem:[%s2322_s0 + $0x18] sm:$0xff]   ;;  %1656 = vmatprep.mubr.msk.bf16.mxu0 %vm77_vm1, %v1750_v36  ;;  %s1914_s0 = smov 64   ;;  %s1915_s11 = smov 96   ;;  %vm1545_vm4 = vcmask 64512  }
   0xc   :  { %1661 = vmatpush3.bf16.msra.mxu0 %v2028_v35  ;;  %v2041_v38 = vld [vmem:[%s2325_s3 + $0x8] sm:$0xff]   ;;  %v186_v39 = vld [vmem:[#allocation5] sm:$0xff]  ;;  %v2076_v56 = vld [vmem:[%s2326_s4] ss:$0 sm:$0xff]  ;;  %s1916_s13 = smov [#allocation7]  }
   0xd   :  { %1576 = vmatmul.mubr.msk.bf16.vlgmr.msra.gmra.mrb[0].mxu1 %vm32_vm2, %v188_v13  ;;  %1662 = vmatprep.subr.bf16.mxu0 %v1911_v11  ;;  %v331_v40 = vpack.c.bf16 %v186_v39, %v186_v39  ;;  %v187_v63 = vld [vmem:[#allocation6] sm:$0xff]  ;;  %s1553_s14 = sshll.u32 %s1916_s13, 4  ;;  %s1554_s14 = int_to_ptr.vmem [resolvable:$true] %s1553_s14 }
   0xe   :  { %291 = vmatpush1.bf16.msra.mxu1 %v1968_v2  ;;  %322 = vmatprep.mubr.bf16.mxu1 %v1910_v3  ;;  %s1886_s1 = scalar_lea.vmem %s1554_s14, 128  ;;  %p1891_p1 = scmp.lt.s32.totalorder %s1554_s14, %s1554_s14 }
   0xf   :  { %292 = vmatprep.subr.bf16.mxu1 %v1979_v6  ;;  %p1887_p0 = scmp.ne.s32.totalorder %s1554_s14, %s1886_s1  ;;  %p1892_p2 = scmp.lt.s32.totalorder %s1886_s1, %s1886_s1 }
  0x10   :  { %1663 = vmatpush3.bf16.msra.mxu0 %v2041_v38 }
  0x11   :  { %1668 = vmatprep.subr.bf16.mxu0 %v1911_v11  ;;  %p1893_p3 = por %p1892_p2, %p1891_p1 }
  0x12   :  { %293 = vmatpush1.bf16.msra.mxu1 %v1985_v7  ;;  %1657 = vmatmul.mubr.msk.bf16.gmra.mrb[4].mxu0 %vm77_vm1, %v1751_v37 }
  0x13   :  { %451 = vmatprep.subr.bf16.mxu1 %v1963_v1  ;;  %1664 = vmatprep.mubr.msk.bf16.mxu0 %vm1913_vm3, %v1911_v11  ;;  %p1894_p4 = pnand %p1893_p3, %p1887_p0 }
  0x1a   :  { %1665 = vmatmul.mubr.msk.bf16.vlgmr.msra.gmra.mrb[8].mxu0 %vm32_vm2, %v331_v40 }
  0x1b   :  { %1669 = vmatpush3.bf16.msra.mxu0 %v2028_v35  ;;  %1672 = vmatprep.mubr.msk.bf16.mxu0 %vm1913_vm3, %v1911_v11 }
  0x1c   :  { %1670 = vmatprep.subr.bf16.mxu0 %v1911_v11 }
  0x1f   :  { %1671 = vmatpush3.bf16.msra.mxu0 %v2041_v38 }
  0x20   :  { %1676 = vmatprep.subr.bf16.mxu0 %v1911_v11 }
  0xdd   :  { %v2013_v14 = vpop.f32.mrb[0].mxu0 }
  0xde   :  { %v130_v15 = vpop.f32.mrb[1].mxu0 }
  0xdf   :  { %v2015_v16 = vpop.f32.mrb[2].mxu0 }
  0xe0   :  { %v2017_v17 = vpop.f32.mrb[3].mxu0  ;;  %v247_v18 = vpop.f32.mrb[0].mxu1 }
  0xe1   :  { %v254_v19 = vadd.f32 %v247_v18, %v130_v15  ;;  %v249_v20 = vpop.f32.mrb[1].mxu1 }
  0xe2   :  { %v250_v21 = vpop.f32.mrb[2].mxu1 }
  0xe3   :  { %1755 = vtanh.f32 %v254_v19  ;;  %v251_v22 = vpop.f32.mrb[3].mxu1  ;;  %v1577_v25 = vmul.f32 -1.442695, %v254_v19 }
  0xe5   :  { %1757 = vpow2.f32 %v1577_v25  ;;  %v2058_v45 = vpop.f32.mrb[4].mxu0 }
  0xe6   :  { %v2060_v46 = vpop.f32.mrb[5].mxu0 }
  0xe7   :  { %v2062_v47 = vpop.f32.mrb[6].mxu0 }
  0xe8   :  { %v2064_v48 = vpop.f32.mrb[7].mxu0 }
  0xed   :  { %v1756_v23 = vpop.eup %1755  ;;  %v381_v49 = vpop.f32.mrb[8].mxu0 }
  0xee   :  { %268 = vrot.lane.b32.xlu0 %v1756_v23, %s1912_s16  ;;  %v1666_v50 = vpop.f32.mrb[9].mxu0 }
  0xef   :  { %v1758_v26 = vpop.eup %1757  ;;  %v384_v51 = vpop.f32.mrb[10].mxu0 }
  0xf0   :  { %v258_v27 = vadd.f32 1.0, %v1758_v26  ;;  %v1667_v52 = vpop.f32.mrb[11].mxu0 }
  0xf2   :  { %263 = vrot.lane.b32.xlu0 %v185_v24, %s1912_s16  ;;  %1759 = vrcp.f32 %v258_v27 }
  0xfc   :  { %v1760_v28 = vpop.eup %1759 }
 0x160   :  { %v269_v29 = vpop.permute.xlu0 %268 }
 0x161   :  { %v271_v30 = vmul.f32 %v1760_v28, %v269_v29 }
 0x163   :  { %273 = vrot.lane.b32.xlu1 %v271_v30, %s1912_s16 }
 0x164   :  { %v264_v31 = vpop.permute.xlu0 %263 }
 0x165   :  { %v266_v32 = vmul.f32 %v1760_v28, %v264_v31 }
 0x1d5   :  { %v274_v33 = vpop.permute.xlu1 %273 }
 0x1d6   :  { %v2022_v34 = vadd.f32 %v274_v33, %v266_v32 }
 0x1d8   :  { %1761 = vtanh.f32 %v2022_v34 }
 0x1e2   :  { %v1762_v41 = vpop.eup %1761 }
 0x1e3   :  { %279 = vrot.lane.b32.xlu1 %v1762_v41, %s1912_s16 }
 0x255   :  { %v280_v42 = vpop.permute.xlu1 %279 }
 0x256   :  { %v282_v43 = vmul.f32 %v1760_v28, %v280_v42 }
 0x258   :  { %v283_v44 = vpack.c.bf16 %v282_v43, %v282_v43 }
 0x25a   :  { %285 = vrot.lane.b32.xlu0 %v283_v44, %s1914_s0 }
 0x2cc   :  { %v286_v53 = vpop.permute.xlu0 %285 }
 0x2cd   :  { %1578 = vmatmul.mubr.msk.bf16.vlgmr.msra.gmra.mrb[4].mxu1 %vm32_vm2, %v286_v53 }
 0x2ce   :  { %452 = vmatpush1.bf16.msra.mxu1 %v1968_v2  ;;  %483 = vmatprep.mubr.bf16.mxu1 %v1910_v3 }
 0x2cf   :  { %453 = vmatprep.subr.bf16.mxu1 %v1979_v6 }
 0x2d2   :  { %454 = vmatpush1.bf16.msra.mxu1 %v1985_v7 }
 0x2d3   :  { %599 = vmatprep.subr.bf16.mxu1 %v1963_v1 }
 0x3a0   :  { %v324_v54 = vpop.f32.mrb[4].mxu1 }
 0x3a1   :  { %v419_v55 = vadd.f32 %v324_v54, %v2017_v17  ;;  %v326_v57 = vpop.f32.mrb[5].mxu1 }
 0x3a2   :  { %v387_v58 = vadd.f32 %v381_v49, %v326_v57  ;;  %v328_v59 = vpop.f32.mrb[6].mxu1 }
 0x3a3   :  { %1763 = vtanh.f32 %v419_v55  ;;  %v329_v60 = vpop.f32.mrb[7].mxu1  ;;  %v1583_v4 = vmul.f32 -1.442695, %v419_v55 }
 0x3a4   :  { %v388_v61 = vadd.f32 %v2076_v56, %v387_v58 }
 0x3a6   :  { %1765 = vtanh.f32 %v388_v61  ;;  %v1582_v5 = vmul.f32 -1.442695, %v388_v61 }
 0x3a7   :  { %1767 = vpow2.f32 %v1583_v4 }
 0x3a8   :  { %1769 = vpow2.f32 %v1582_v5 }
 0x3ad   :  { %v1764_v62 = vpop.eup %1763 }
 0x3ae   :  { %429 = vrot.lane.b32.xlu1 %v1764_v62, %s1912_s16 }
 0x3b0   :  { %v1766_v0 = vpop.eup %1765 }
 0x3b1   :  { %402 = vrot.lane.b32.xlu0 %v1766_v0, %s1912_s16  ;;  %v1768_v8 = vpop.eup %1767 }
 0x3b2   :  { %397 = vrot.lane.b32.xlu1 %v187_v63, %s1912_s16  ;;  %v1770_v9 = vpop.eup %1769  ;;  %v423_v10 = vadd.f32 1.0, %v1768_v8 }
 0x3b3   :  { %v392_v12 = vadd.f32 1.0, %v1770_v9 }
 0x3b4   :  { %1771 = vrcp.f32 %v423_v10 }
 0x3b5   :  { %1773 = vrcp.f32 %v392_v12 }
 0x3be   :  { %v1772_v13 = vpop.eup %1771 }
 0x3bf   :  { %v1774_v18 = vpop.eup %1773  ;;  %v427_v22 = vmul.f32 %v1772_v13, %v2022_v34 }
 0x420   :  { %v430_v15 = vpop.permute.xlu1 %429 }
 0x421   :  { %v432_v17 = vmul.f32 %v1772_v13, %v430_v15 }
 0x423   :  { %434 = vrot.lane.b32.xlu0 %v432_v17, %s1912_s16  ;;  %v403_v19 = vpop.permute.xlu0 %402 }
 0x424   :  { %v405_v20 = vmul.f32 %v1774_v18, %v403_v19  ;;  %v398_v21 = vpop.permute.xlu1 %397 }
 0x425   :  { %v400_v25 = vmul.f32 %v1774_v18, %v398_v21 }
 0x426   :  { %407 = vrot.lane.b32.xlu1 %v405_v20, %s1912_s16 }
 0x495   :  { %v435_v23 = vpop.permute.xlu0 %434 }
 0x496   :  { %v2085_v24 = vadd.f32 %v435_v23, %v427_v22 }
 0x498   :  { %1775 = vtanh.f32 %v2085_v24  ;;  %v408_v26 = vpop.permute.xlu1 %407 }
 0x499   :  { %v2088_v27 = vadd.f32 %v408_v26, %v400_v25 }
 0x49b   :  { %1777 = vtanh.f32 %v2088_v27 }
 0x4a2   :  { %v1776_v28 = vpop.eup %1775 }
 0x4a3   :  { %440 = vrot.lane.b32.xlu0 %v1776_v28, %s1912_s16 }
 0x4a5   :  { %v1778_v29 = vpop.eup %1777 }
 0x4a6   :  { %413 = vrot.lane.b32.xlu1 %v1778_v29, %s1912_s16 }
 0x515   :  { %v441_v30 = vpop.permute.xlu0 %440 }
 0x516   :  { %v443_v31 = vmul.f32 %v1772_v13, %v441_v30 }
 0x518   :  { %v444_v32 = vpack.c.bf16 %v443_v31, %v443_v31  ;;  %v414_v33 = vpop.permute.xlu1 %413 }
 0x519   :  { %v416_v34 = vmul.f32 %v1774_v18, %v414_v33 }
 0x51a   :  { %446 = vrot.lane.b32.xlu0 %v444_v32, %s1914_s0 }
 0x51b   :  { %v492_v36 = vpack.c.bf16 %v416_v34, %v416_v34 }
 0x51d   :  { %494 = vrot.lane.b32.xlu1 %v492_v36, %s1914_s0 }
 0x58c   :  { %v447_v37 = vpop.permute.xlu0 %446 }
 0x58d   :  { %1584 = vmatmul.mubr.msk.bf16.vlgmr.msra.gmra.mrb[8].mxu1 %vm32_vm2, %v447_v37 }
 0x58e   :  { %600 = vmatpush1.bf16.msra.mxu1 %v1968_v2  ;;  %631 = vmatprep.mubr.bf16.mxu1 %v1910_v3 }
 0x58f   :  { %v495_v39 = vpop.permute.xlu1 %494  ;;  %601 = vmatprep.subr.bf16.mxu1 %v1979_v6 }
 0x590   :  { %1673 = vmatmul.mubr.msk.bf16.vlgmr.msra.gmra.mrb[12].mxu0 %vm32_vm2, %v495_v39 }
 0x591   :  { %1677 = vmatpush3.bf16.msra.mxu0 %v2028_v35  ;;  %1680 = vmatprep.mubr.msk.bf16.mxu0 %vm1913_vm3, %v1911_v11 }
 0x592   :  { %602 = vmatpush1.bf16.msra.mxu1 %v1985_v7  ;;  %1678 = vmatprep.subr.bf16.mxu0 %v1911_v11 }
 0x593   :  { %747 = vmatprep.subr.bf16.mxu1 %v1963_v1 }
 0x595   :  { %1679 = vmatpush3.bf16.msra.mxu0 %v2041_v38 }
 0x596   :  { %1684 = vmatprep.subr.bf16.mxu0 %v1911_v11 }
 0x660   :  { %v485_v40 = vpop.f32.mrb[8].mxu1 }
 0x661   :  { %v567_v41 = vadd.f32 %v2013_v14, %v485_v40  ;;  %v487_v42 = vpop.f32.mrb[9].mxu1 }
 0x662   :  { %v489_v43 = vpop.f32.mrb[10].mxu1 }
 0x663   :  { %1779 = vtanh.f32 %v567_v41  ;;  %v490_v44 = vpop.f32.mrb[11].mxu1  ;;  %v533_v49 = vpop.f32.mrb[12].mxu0  ;;  %v1587_v58 = vmul.f32 -1.442695, %v567_v41 }
 0x664   :  { %v539_v50 = vadd.f32 %v533_v49, %v487_v42  ;;  %v1674_v51 = vpop.f32.mrb[13].mxu0 }
 0x665   :  { %v536_v52 = vpop.f32.mrb[14].mxu0 }
 0x666   :  { %v540_v53 = vadd.f32 %v2076_v56, %v539_v50  ;;  %v1675_v54 = vpop.f32.mrb[15].mxu0 }
 0x668   :  { %1781 = vtanh.f32 %v540_v53  ;;  %v1586_v14 = vmul.f32 -1.442695, %v540_v53 }
 0x669   :  { %1783 = vpow2.f32 %v1587_v58 }
 0x66a   :  { %1785 = vpow2.f32 %v1586_v14 }
 0x66d   :  { %v1780_v55 = vpop.eup %1779 }
 0x66e   :  { %577 = vrot.lane.b32.xlu0 %v1780_v55, %s1912_s16 }
 0x672   :  { %v1782_v57 = vpop.eup %1781 }
 0x673   :  { %550 = vrot.lane.b32.xlu1 %v1782_v57, %s1912_s16  ;;  %v1784_v59 = vpop.eup %1783 }
 0x674   :  { %v571_v60 = vadd.f32 1.0, %v1784_v59  ;;  %v1786_v61 = vpop.eup %1785 }
 0x675   :  { %v544_v62 = vadd.f32 1.0, %v1786_v61 }
 0x676   :  { %1787 = vrcp.f32 %v571_v60 }
 0x677   :  { %1789 = vrcp.f32 %v544_v62 }
 0x680   :  { %v1788_v63 = vpop.eup %1787 }
 0x681   :  { %v1790_v5 = vpop.eup %1789  ;;  %v575_v10 = vmul.f32 %v1788_v63, %v2085_v24 }
 0x682   :  { %v548_v15 = vmul.f32 %v1790_v5, %v2088_v27 }
 0x6e0   :  { %v578_v0 = vpop.permute.xlu0 %577 }
 0x6e1   :  { %v580_v4 = vmul.f32 %v1788_v63, %v578_v0 }
 0x6e3   :  { %582 = vrot.lane.b32.xlu0 %v580_v4, %s1912_s16 }
 0x6e5   :  { %v551_v8 = vpop.permute.xlu1 %550 }
 0x6e6   :  { %v553_v9 = vmul.f32 %v1790_v5, %v551_v8 }
 0x6e8   :  { %555 = vrot.lane.b32.xlu1 %v553_v9, %s1912_s16 }
 0x755   :  { %v583_v12 = vpop.permute.xlu0 %582 }
 0x756   :  { %v2115_v13 = vadd.f32 %v583_v12, %v575_v10 }
 0x758   :  { %1791 = vtanh.f32 %v2115_v13 }
 0x75a   :  { %v556_v17 = vpop.permute.xlu1 %555 }
 0x75b   :  { %v2119_v18 = vadd.f32 %v556_v17, %v548_v15 }
 0x75d   :  { %1793 = vtanh.f32 %v2119_v18 }
 0x762   :  { %v1792_v19 = vpop.eup %1791 }
 0x763   :  { %588 = vrot.lane.b32.xlu0 %v1792_v19, %s1912_s16 }
 0x767   :  { %v1794_v20 = vpop.eup %1793 }
 0x768   :  { %561 = vrot.lane.b32.xlu1 %v1794_v20, %s1912_s16 }
 0x7d5   :  { %v589_v21 = vpop.permute.xlu0 %588 }
 0x7d6   :  { %v591_v22 = vmul.f32 %v1788_v63, %v589_v21 }
 0x7d8   :  { %v592_v23 = vpack.c.bf16 %v591_v22, %v591_v22 }
 0x7da   :  { %594 = vrot.lane.b32.xlu0 %v592_v23, %s1914_s0  ;;  %v562_v24 = vpop.permute.xlu1 %561 }
 0x7db   :  { %v564_v25 = vmul.f32 %v1790_v5, %v562_v24 }
 0x7dd   :  { %v640_v26 = vpack.c.bf16 %v564_v25, %v564_v25 }
 0x7df   :  { %642 = vrot.lane.b32.xlu1 %v640_v26, %s1914_s0 }
 0x84c   :  { %v595_v27 = vpop.permute.xlu0 %594 }
 0x84d   :  { %1588 = vmatmul.mubr.msk.bf16.vlgmr.msra.gmra.mrb[12].mxu1 %vm32_vm2, %v595_v27 }
 0x84e   :  { %748 = vmatpush1.bf16.msra.mxu1 %v1968_v2  ;;  %779 = vmatprep.mubr.bf16.mxu1 %v1910_v3 }
 0x84f   :  { %749 = vmatprep.subr.bf16.mxu1 %v1979_v6 }
 0x851   :  { %v643_v28 = vpop.permute.xlu1 %642 }
 0x852   :  { %1681 = vmatmul.mubr.msk.bf16.vlgmr.msra.gmra.mrb[16].mxu0 %vm32_vm2, %v643_v28  ;;  %750 = vmatpush1.bf16.msra.mxu1 %v1985_v7 }
 0x853   :  { %1685 = vmatpush3.bf16.msra.mxu0 %v2028_v35  ;;  %1688 = vmatprep.mubr.msk.bf16.mxu0 %vm1913_vm3, %v1911_v11 }
 0x854   :  { %1686 = vmatprep.subr.bf16.mxu0 %v1911_v11  ;;  %895 = vmatprep.subr.bf16.mxu1 %v1963_v1 }
 0x857   :  { %1687 = vmatpush3.bf16.msra.mxu0 %v2041_v38 }
 0x858   :  { %1692 = vmatprep.subr.bf16.mxu0 %v1911_v11 }
 0x920   :  { %v633_v29 = vpop.f32.mrb[12].mxu1 }
 0x921   :  { %v715_v30 = vadd.f32 %v2015_v16, %v633_v29  ;;  %v635_v31 = vpop.f32.mrb[13].mxu1 }
 0x922   :  { %v637_v32 = vpop.f32.mrb[14].mxu1 }
 0x923   :  { %1795 = vtanh.f32 %v715_v30  ;;  %v638_v33 = vpop.f32.mrb[15].mxu1  ;;  %v1591_v44 = vmul.f32 -1.442695, %v715_v30 }
 0x925   :  { %v681_v34 = vpop.f32.mrb[16].mxu0 }
 0x926   :  { %v687_v36 = vadd.f32 %v681_v34, %v635_v31  ;;  %v1682_v37 = vpop.f32.mrb[17].mxu0 }
 0x927   :  { %v684_v39 = vpop.f32.mrb[18].mxu0 }
 0x928   :  { %v688_v40 = vadd.f32 %v2076_v56, %v687_v36  ;;  %v1683_v41 = vpop.f32.mrb[19].mxu0 }
 0x92a   :  { %1797 = vtanh.f32 %v688_v40  ;;  %v1590_v16 = vmul.f32 -1.442695, %v688_v40 }
 0x92b   :  { %1799 = vpow2.f32 %v1591_v44 }
 0x92c   :  { %1801 = vpow2.f32 %v1590_v16 }
 0x92d   :  { %v1796_v42 = vpop.eup %1795 }
 0x92e   :  { %725 = vrot.lane.b32.xlu0 %v1796_v42, %s1912_s16 }
 0x934   :  { %v1798_v43 = vpop.eup %1797 }
 0x935   :  { %698 = vrot.lane.b32.xlu1 %v1798_v43, %s1912_s16  ;;  %v1800_v49 = vpop.eup %1799 }
 0x936   :  { %v719_v50 = vadd.f32 1.0, %v1800_v49  ;;  %v1802_v51 = vpop.eup %1801 }
 0x937   :  { %v692_v52 = vadd.f32 1.0, %v1802_v51 }
 0x938   :  { %1803 = vrcp.f32 %v719_v50 }
 0x939   :  { %1805 = vrcp.f32 %v692_v52 }
 0x942   :  { %v1804_v53 = vpop.eup %1803 }
 0x943   :  { %v1806_v57 = vpop.eup %1805  ;;  %v723_v59 = vmul.f32 %v1804_v53, %v2115_v13 }
 0x944   :  { %v696_v62 = vmul.f32 %v1806_v57, %v2119_v18 }
 0x9a0   :  { %v726_v54 = vpop.permute.xlu0 %725 }
 0x9a1   :  { %v728_v55 = vmul.f32 %v1804_v53, %v726_v54 }
 0x9a3   :  { %730 = vrot.lane.b32.xlu0 %v728_v55, %s1912_s16 }
 0x9a7   :  { %v699_v58 = vpop.permute.xlu1 %698 }
 0x9a8   :  { %v701_v14 = vmul.f32 %v1806_v57, %v699_v58 }
 0x9aa   :  { %703 = vrot.lane.b32.xlu1 %v701_v14, %s1912_s16 }
 0xa15   :  { %v731_v60 = vpop.permute.xlu0 %730 }
 0xa16   :  { %v2146_v61 = vadd.f32 %v731_v60, %v723_v59 }
 0xa18   :  { %1807 = vtanh.f32 %v2146_v61 }
 0xa1c   :  { %v704_v63 = vpop.permute.xlu1 %703 }
 0xa1d   :  { %v2150_v0 = vadd.f32 %v704_v63, %v696_v62 }
 0xa1f   :  { %1809 = vtanh.f32 %v2150_v0 }
 0xa22   :  { %v1808_v4 = vpop.eup %1807 }
 0xa23   :  { %736 = vrot.lane.b32.xlu0 %v1808_v4, %s1912_s16 }
 0xa29   :  { %v1810_v5 = vpop.eup %1809 }
 0xa2a   :  { %709 = vrot.lane.b32.xlu1 %v1810_v5, %s1912_s16 }
 0xa95   :  { %v737_v8 = vpop.permute.xlu0 %736 }
 0xa96   :  { %v739_v9 = vmul.f32 %v1804_v53, %v737_v8 }
 0xa98   :  { %v740_v10 = vpack.c.bf16 %v739_v9, %v739_v9 }
 0xa9a   :  { %742 = vrot.lane.b32.xlu0 %v740_v10, %s1914_s0 }
 0xa9c   :  { %v710_v12 = vpop.permute.xlu1 %709 }
 0xa9d   :  { %v712_v13 = vmul.f32 %v1806_v57, %v710_v12 }
 0xa9f   :  { %v788_v15 = vpack.c.bf16 %v712_v13, %v712_v13 }
 0xaa1   :  { %790 = vrot.lane.b32.xlu1 %v788_v15, %s1914_s0 }
 0xb0c   :  { %v743_v17 = vpop.permute.xlu0 %742 }
 0xb0d   :  { %1592 = vmatmul.mubr.msk.bf16.vlgmr.msra.gmra.mrb[16].mxu1 %vm32_vm2, %v743_v17 }
 0xb0e   :  { %896 = vmatpush1.bf16.msra.mxu1 %v1968_v2  ;;  %927 = vmatprep.mubr.bf16.mxu1 %v1910_v3 }
 0xb0f   :  { %897 = vmatprep.subr.bf16.mxu1 %v1979_v6 }
 0xb12   :  { %898 = vmatpush1.bf16.msra.mxu1 %v1985_v7 }
 0xb13   :  { %v791_v18 = vpop.permute.xlu1 %790  ;;  %1043 = vmatprep.subr.bf16.mxu1 %v1963_v1 }
 0xb14   :  { %1689 = vmatmul.mubr.msk.bf16.vlgmr.msra.gmra.mrb[20].mxu0 %vm32_vm2, %v791_v18 }
 0xb15   :  { %1693 = vmatpush3.bf16.msra.mxu0 %v2028_v35  ;;  %1696 = vmatprep.mubr.msk.bf16.mxu0 %vm1913_vm3, %v1911_v11 }
 0xb16   :  { %1694 = vmatprep.subr.bf16.mxu0 %v1911_v11 }
 0xb19   :  { %1695 = vmatpush3.bf16.msra.mxu0 %v2041_v38 }
 0xb1a   :  { %1700 = vmatprep.subr.bf16.mxu0 %v1911_v11 }
 0xbe0   :  { %v781_v19 = vpop.f32.mrb[16].mxu1 }
 0xbe1   :  { %v863_v20 = vadd.f32 %v781_v19, %v2060_v46  ;;  %v783_v21 = vpop.f32.mrb[17].mxu1 }
 0xbe2   :  { %v785_v22 = vpop.f32.mrb[18].mxu1 }
 0xbe3   :  { %1811 = vtanh.f32 %v863_v20  ;;  %v786_v23 = vpop.f32.mrb[19].mxu1  ;;  %v1595_v32 = vmul.f32 -1.442695, %v863_v20 }
 0xbe7   :  { %v829_v24 = vpop.f32.mrb[20].mxu0 }
 0xbe8   :  { %v835_v25 = vadd.f32 %v829_v24, %v783_v21  ;;  %v1690_v26 = vpop.f32.mrb[21].mxu0 }
 0xbe9   :  { %v832_v27 = vpop.f32.mrb[22].mxu0 }
 0xbea   :  { %v836_v28 = vadd.f32 %v2076_v56, %v835_v25  ;;  %v1691_v29 = vpop.f32.mrb[23].mxu0 }
 0xbec   :  { %1813 = vtanh.f32 %v836_v28  ;;  %v1594_v46 = vmul.f32 -1.442695, %v836_v28 }
 0xbed   :  { %v1812_v30 = vpop.eup %1811  ;;  %1815 = vpow2.f32 %v1595_v32 }
 0xbee   :  { %873 = vrot.lane.b32.xlu0 %v1812_v30, %s1912_s16  ;;  %1817 = vpow2.f32 %v1594_v46 }
 0xbf6   :  { %v1814_v31 = vpop.eup %1813 }
 0xbf7   :  { %846 = vrot.lane.b32.xlu1 %v1814_v31, %s1912_s16  ;;  %v1816_v33 = vpop.eup %1815 }
 0xbf8   :  { %v867_v34 = vadd.f32 1.0, %v1816_v33  ;;  %v1818_v36 = vpop.eup %1817 }
 0xbf9   :  { %v840_v37 = vadd.f32 1.0, %v1818_v36 }
 0xbfa   :  { %1819 = vrcp.f32 %v867_v34 }
 0xbfb   :  { %1821 = vrcp.f32 %v840_v37 }
 0xc04   :  { %v1820_v39 = vpop.eup %1819 }
 0xc05   :  { %v1822_v42 = vpop.eup %1821  ;;  %v871_v16 = vmul.f32 %v1820_v39, %v2146_v61 }
 0xc06   :  { %v844_v51 = vmul.f32 %v1822_v42, %v2150_v0 }
 0xc60   :  { %v874_v40 = vpop.permute.xlu0 %873 }
 0xc61   :  { %v876_v41 = vmul.f32 %v1820_v39, %v874_v40 }
 0xc63   :  { %878 = vrot.lane.b32.xlu0 %v876_v41, %s1912_s16 }
 0xc69   :  { %v847_v43 = vpop.permute.xlu1 %846 }
 0xc6a   :  { %v849_v44 = vmul.f32 %v1822_v42, %v847_v43 }
 0xc6c   :  { %851 = vrot.lane.b32.xlu1 %v849_v44, %s1912_s16 }
 0xcd5   :  { %v879_v49 = vpop.permute.xlu0 %878 }
 0xcd6   :  { %v2177_v50 = vadd.f32 %v879_v49, %v871_v16 }
 0xcd8   :  { %1823 = vtanh.f32 %v2177_v50 }
 0xcde   :  { %v852_v52 = vpop.permute.xlu1 %851 }
 0xcdf   :  { %v2181_v53 = vadd.f32 %v852_v52, %v844_v51 }
 0xce1   :  { %1825 = vtanh.f32 %v2181_v53 }
 0xce2   :  { %v1824_v54 = vpop.eup %1823 }
 0xce3   :  { %884 = vrot.lane.b32.xlu0 %v1824_v54, %s1912_s16 }
 0xceb   :  { %v1826_v55 = vpop.eup %1825 }
 0xcec   :  { %857 = vrot.lane.b32.xlu1 %v1826_v55, %s1912_s16 }
 0xd55   :  { %v885_v57 = vpop.permute.xlu0 %884 }
 0xd56   :  { %v887_v58 = vmul.f32 %v1820_v39, %v885_v57 }
 0xd58   :  { %v888_v14 = vpack.c.bf16 %v887_v58, %v887_v58 }
 0xd5a   :  { %890 = vrot.lane.b32.xlu0 %v888_v14, %s1914_s0 }
 0xd5e   :  { %v858_v59 = vpop.permute.xlu1 %857 }
 0xd5f   :  { %v860_v60 = vmul.f32 %v1822_v42, %v858_v59 }
 0xd61   :  { %v936_v61 = vpack.c.bf16 %v860_v60, %v860_v60 }
 0xd63   :  { %938 = vrot.lane.b32.xlu1 %v936_v61, %s1914_s0 }
 0xdcc   :  { %v891_v62 = vpop.permute.xlu0 %890 }
 0xdcd   :  { %1596 = vmatmul.mubr.msk.bf16.vlgmr.msra.gmra.mrb[20].mxu1 %vm32_vm2, %v891_v62 }
 0xdce   :  { %1044 = vmatpush1.bf16.msra.mxu1 %v1968_v2  ;;  %1075 = vmatprep.mubr.bf16.mxu1 %v1910_v3 }
 0xdcf   :  { %1045 = vmatprep.subr.bf16.mxu1 %v1979_v6 }
 0xdd2   :  { %1046 = vmatpush1.bf16.msra.mxu1 %v1985_v7 }
 0xdd3   :  { %1191 = vmatprep.subr.bf16.mxu1 %v1963_v1 }
 0xdd5   :  { %v939_v63 = vpop.permute.xlu1 %938 }
 0xdd6   :  { %1697 = vmatmul.mubr.msk.bf16.vlgmr.msra.gmra.mrb[24].mxu0 %vm32_vm2, %v939_v63 }
 0xdd7   :  { %1701 = vmatpush3.bf16.msra.mxu0 %v2028_v35  ;;  %1704 = vmatprep.mubr.msk.bf16.mxu0 %vm1913_vm3, %v1911_v11 }
 0xdd8   :  { %1702 = vmatprep.subr.bf16.mxu0 %v1911_v11 }
 0xddb   :  { %1703 = vmatpush3.bf16.msra.mxu0 %v2041_v38 }
 0xddc   :  { %1708 = vmatprep.subr.bf16.mxu0 %v1911_v11 }
 0xea0   :  { %v929_v0 = vpop.f32.mrb[20].mxu1 }
 0xea1   :  { %v1011_v4 = vadd.f32 %v929_v0, %v2064_v48  ;;  %v931_v5 = vpop.f32.mrb[21].mxu1 }
 0xea2   :  { %v933_v8 = vpop.f32.mrb[22].mxu1 }
 0xea3   :  { %1827 = vtanh.f32 %v1011_v4  ;;  %v934_v9 = vpop.f32.mrb[23].mxu1  ;;  %v1599_v21 = vmul.f32 -1.442695, %v1011_v4 }
 0xea9   :  { %v977_v10 = vpop.f32.mrb[24].mxu0 }
 0xeaa   :  { %v983_v12 = vadd.f32 %v977_v10, %v931_v5  ;;  %v1698_v13 = vpop.f32.mrb[25].mxu0 }
 0xeab   :  { %v980_v15 = vpop.f32.mrb[26].mxu0 }
 0xeac   :  { %v984_v17 = vadd.f32 %v2076_v56, %v983_v12  ;;  %v1699_v18 = vpop.f32.mrb[27].mxu0 }
 0xead   :  { %v1828_v19 = vpop.eup %1827 }
 0xeae   :  { %1829 = vtanh.f32 %v984_v17  ;;  %1021 = vrot.lane.b32.xlu0 %v1828_v19, %s1912_s16  ;;  %v1598_v48 = vmul.f32 -1.442695, %v984_v17 }
 0xeaf   :  { %1831 = vpow2.f32 %v1599_v21 }
 0xeb0   :  { %1833 = vpow2.f32 %v1598_v48 }
 0xeb8   :  { %v1830_v20 = vpop.eup %1829 }
 0xeb9   :  { %994 = vrot.lane.b32.xlu1 %v1830_v20, %s1912_s16  ;;  %v1832_v22 = vpop.eup %1831 }
 0xeba   :  { %v1015_v23 = vadd.f32 1.0, %v1832_v22  ;;  %v1834_v24 = vpop.eup %1833 }
 0xebb   :  { %v988_v25 = vadd.f32 1.0, %v1834_v24 }
 0xebc   :  { %1835 = vrcp.f32 %v1015_v23 }
 0xebd   :  { %1837 = vrcp.f32 %v988_v25 }
 0xec6   :  { %v1836_v26 = vpop.eup %1835 }
 0xec7   :  { %v1838_v29 = vpop.eup %1837  ;;  %v1019_v32 = vmul.f32 %v1836_v26, %v2177_v50 }
 0xec8   :  { %v992_v34 = vmul.f32 %v1838_v29, %v2181_v53 }
 0xf20   :  { %v1022_v27 = vpop.permute.xlu0 %1021 }
 0xf21   :  { %v1024_v28 = vmul.f32 %v1836_v26, %v1022_v27 }
 0xf23   :  { %1026 = vrot.lane.b32.xlu0 %v1024_v28, %s1912_s16 }
 0xf2b   :  { %v995_v30 = vpop.permute.xlu1 %994 }
 0xf2c   :  { %v997_v31 = vmul.f32 %v1838_v29, %v995_v30  ;;  %v1883_v30 = vld [vmem:[%s2324_s2] ss:$8 sps:$4 sm:$0xff]  }
 0xf2e   :  { %999 = vrot.lane.b32.xlu1 %v997_v31, %s1912_s16  ;;  %v1884_v31 = vld [vmem:[%s2324_s2 + $0x14] ss:$8 sps:$4 sm:$0xff]  }
 0xf95   :  { %v1027_v46 = vpop.permute.xlu0 %1026 }
 0xf96   :  { %v2208_v33 = vadd.f32 %v1027_v46, %v1019_v32  ;;  %v1885_v32 = vld [vmem:[%s2324_s2 + $0x10] ss:$8 sps:$4 sm:$0xff]  }
 0xf98   :  { %1839 = vtanh.f32 %v2208_v33 }
 0xfa0   :  { %v1000_v36 = vpop.permute.xlu1 %999 }
 0xfa1   :  { %v2212_v37 = vadd.f32 %v1000_v36, %v992_v34 }
 0xfa2   :  { %v1840_v39 = vpop.eup %1839 }
 0xfa3   :  { %1841 = vtanh.f32 %v2212_v37  ;;  %1032 = vrot.lane.b32.xlu0 %v1840_v39, %s1912_s16 }
 0xfad   :  { %v1842_v40 = vpop.eup %1841 }
 0xfae   :  { %1005 = vrot.lane.b32.xlu1 %v1842_v40, %s1912_s16 }
0x1015   :  { %v1033_v41 = vpop.permute.xlu0 %1032 }
0x1016   :  { %v1035_v42 = vmul.f32 %v1836_v26, %v1033_v41 }
0x1018   :  { %v1036_v43 = vpack.c.bf16 %v1035_v42, %v1035_v42 }
0x101a   :  { %1038 = vrot.lane.b32.xlu0 %v1036_v43, %s1914_s0 }
0x1020   :  { %v1006_v44 = vpop.permute.xlu1 %1005 }
0x1021   :  { %v1008_v16 = vmul.f32 %v1838_v29, %v1006_v44 }
0x1023   :  { %v1084_v49 = vpack.c.bf16 %v1008_v16, %v1008_v16 }
0x1025   :  { %1086 = vrot.lane.b32.xlu1 %v1084_v49, %s1914_s0 }
0x108c   :  { %v1039_v50 = vpop.permute.xlu0 %1038 }
0x108d   :  { %1600 = vmatmul.mubr.msk.bf16.vlgmr.msra.gmra.mrb[24].mxu1 %vm32_vm2, %v1039_v50 }
0x108e   :  { %1192 = vmatpush1.bf16.msra.mxu1 %v1968_v2  ;;  %1223 = vmatprep.mubr.bf16.mxu1 %v1910_v3 }
0x108f   :  { %1193 = vmatprep.subr.bf16.mxu1 %v1979_v6 }
0x1092   :  { %1194 = vmatpush1.bf16.msra.mxu1 %v1985_v7 }
0x1093   :  { %1339 = vmatprep.subr.bf16.mxu1 %v1963_v1 }
0x1097   :  { %v1087_v51 = vpop.permute.xlu1 %1086 }
0x1098   :  { %1705 = vmatmul.mubr.msk.bf16.vlgmr.msra.gmra.mrb[28].mxu0 %vm32_vm2, %v1087_v51 }
0x1099   :  { %1709 = vmatpush3.bf16.msra.mxu0 %v2028_v35  ;;  %1712 = vmatprep.mubr.msk.bf16.mxu0 %vm1913_vm3, %v1911_v11 }
0x109a   :  { %1710 = vmatprep.subr.bf16.mxu0 %v1911_v11 }
0x109d   :  { %1711 = vmatpush3.bf16.msra.mxu0 %v2041_v38 }
0x109e   :  { %1716 = vmatprep.subr.bf16.mxu0 %v1911_v11 }
0x1160   :  { %v1077_v2 = vpop.f32.mrb[24].mxu1 }
0x1161   :  { %v1159_v6 = vadd.f32 %v2058_v45, %v1077_v2  ;;  %v1079_v7 = vpop.f32.mrb[25].mxu1 }
0x1162   :  { %v1081_v52 = vpop.f32.mrb[26].mxu1 }
0x1163   :  { %1843 = vtanh.f32 %v1159_v6  ;;  %v1082_v1 = vpop.f32.mrb[27].mxu1  ;;  %v1603_v61 = vmul.f32 -1.442695, %v1159_v6 }
0x116b   :  { %v1125_v53 = vpop.f32.mrb[28].mxu0 }
0x116c   :  { %v1131_v54 = vadd.f32 %v1125_v53, %v1079_v7  ;;  %v1706_v55 = vpop.f32.mrb[29].mxu0 }
0x116d   :  { %v1844_v57 = vpop.eup %1843  ;;  %v1128_v58 = vpop.f32.mrb[30].mxu0 }
0x116e   :  { %v1132_v14 = vadd.f32 %v2076_v56, %v1131_v54  ;;  %v1707_v59 = vpop.f32.mrb[31].mxu0  ;;  %1169 = vrot.lane.b32.xlu0 %v1844_v57, %s1912_s16 }
0x1170   :  { %1845 = vtanh.f32 %v1132_v14  ;;  %v1602_v45 = vmul.f32 -1.442695, %v1132_v14 }
0x1171   :  { %1847 = vpow2.f32 %v1603_v61 }
0x1172   :  { %1849 = vpow2.f32 %v1602_v45 }
0x117a   :  { %v1846_v60 = vpop.eup %1845 }
0x117b   :  { %1142 = vrot.lane.b32.xlu1 %v1846_v60, %s1912_s16  ;;  %v1848_v62 = vpop.eup %1847 }
0x117c   :  { %v1163_v63 = vadd.f32 1.0, %v1848_v62  ;;  %v1850_v0 = vpop.eup %1849 }
0x117d   :  { %v1136_v4 = vadd.f32 1.0, %v1850_v0 }
0x117e   :  { %1851 = vrcp.f32 %v1163_v63 }
0x117f   :  { %1853 = vrcp.f32 %v1136_v4 }
0x1188   :  { %v1852_v5 = vpop.eup %1851 }
0x1189   :  { %v1854_v10 = vpop.eup %1853  ;;  %v1167_v15 = vmul.f32 %v1852_v5, %v2208_v33 }
0x118a   :  { %v1140_v19 = vmul.f32 %v1854_v10, %v2212_v37 }
0x11e0   :  { %v1170_v8 = vpop.permute.xlu0 %1169 }
0x11e1   :  { %v1172_v9 = vmul.f32 %v1852_v5, %v1170_v8 }
0x11e3   :  { %1174 = vrot.lane.b32.xlu0 %v1172_v9, %s1912_s16 }
0x11ed   :  { %v1143_v12 = vpop.permute.xlu1 %1142 }
0x11ee   :  { %v1145_v13 = vmul.f32 %v1854_v10, %v1143_v12 }
0x11f0   :  { %1147 = vrot.lane.b32.xlu1 %v1145_v13, %s1912_s16 }
0x1255   :  { %v1175_v17 = vpop.permute.xlu0 %1174 }
0x1256   :  { %v2239_v18 = vadd.f32 %v1175_v17, %v1167_v15 }
0x1258   :  { %1855 = vtanh.f32 %v2239_v18 }
0x1262   :  { %v1856_v20 = vpop.eup %1855  ;;  %v1148_v21 = vpop.permute.xlu1 %1147 }
0x1263   :  { %v2243_v48 = vadd.f32 %v1148_v21, %v1140_v19  ;;  %1180 = vrot.lane.b32.xlu0 %v1856_v20, %s1912_s16 }
0x1265   :  { %1857 = vtanh.f32 %v2243_v48 }
0x126f   :  { %v1858_v22 = vpop.eup %1857 }
0x1270   :  { %1153 = vrot.lane.b32.xlu1 %v1858_v22, %s1912_s16 }
0x12d5   :  { %v1181_v23 = vpop.permute.xlu0 %1180 }
0x12d6   :  { %v1183_v24 = vmul.f32 %v1852_v5, %v1181_v23 }
0x12d8   :  { %v1184_v25 = vpack.c.bf16 %v1183_v24, %v1183_v24 }
0x12da   :  { %1186 = vrot.lane.b32.xlu0 %v1184_v25, %s1914_s0 }
0x12e2   :  { %v1154_v26 = vpop.permute.xlu1 %1153 }
0x12e3   :  { %v1156_v27 = vmul.f32 %v1854_v10, %v1154_v26 }
0x12e5   :  { %v1232_v28 = vpack.c.bf16 %v1156_v27, %v1156_v27 }
0x12e7   :  { %1234 = vrot.lane.b32.xlu1 %v1232_v28, %s1914_s0 }
0x134c   :  { %v1187_v29 = vpop.permute.xlu0 %1186 }
0x134d   :  { %1604 = vmatmul.mubr.msk.bf16.vlgmr.msra.gmra.mrb[28].mxu1 %vm32_vm2, %v1187_v29 }
0x134e   :  { %1340 = vmatpush1.bf16.msra.mxu1 %v1883_v30  ;;  %1371 = vmatprep.mubr.bf16.mxu1 %v1910_v3 }
0x134f   :  { %1341 = vmatprep.subr.bf16.mxu1 %v1884_v31 }
0x1352   :  { %1342 = vmatpush1.bf16.msra.mxu1 %v1885_v32 }
0x1353   :  { %1724 = vmatprep.subr.bf16.mxu1 %v1911_v11 }
0x1359   :  { %v1235_v46 = vpop.permute.xlu1 %1234 }
0x135a   :  { %1713 = vmatmul.mubr.msk.bf16.vlgmr.msra.gmra.mrb[32].mxu0 %vm32_vm2, %v1235_v46  ;;  %v1753_v46 = vld [vmem:[%s2327_s5] sm:$0xff]  }
0x135b   :  { %1717 = vmatpush3.bf16.msra.mxu0 %v2028_v35  ;;  %1720 = vmatprep.mubr.msk.bf16.mxu0 %vm1913_vm3, %v1911_v11 }
0x135c   :  { %1718 = vmatprep.subr.bf16.mxu0 %v1911_v11 }
0x135f   :  { %1719 = vmatpush3.bf16.msra.mxu0 %v2041_v38 }
0x1420   :  { %v1225_v3 = vpop.f32.mrb[28].mxu1 }
0x1421   :  { %v1307_v33 = vadd.f32 %v2062_v47, %v1225_v3  ;;  %v1227_v34 = vpop.f32.mrb[29].mxu1  ;;  %v1754_v3 = vld [vmem:[%s2327_s5 + $0x8] sm:$0xff]  }
0x1422   :  { %v1229_v36 = vpop.f32.mrb[30].mxu1 }
0x1423   :  { %1859 = vtanh.f32 %v1307_v33  ;;  %v1230_v37 = vpop.f32.mrb[31].mxu1  ;;  %v1607_v38 = vmul.f32 -1.442695, %v1307_v33 }
0x142d   :  { %v1860_v39 = vpop.eup %1859  ;;  %v1273_v40 = vpop.f32.mrb[32].mxu0 }
0x142e   :  { %v1279_v41 = vadd.f32 %v1273_v40, %v1227_v34  ;;  %v1714_v42 = vpop.f32.mrb[33].mxu0  ;;  %1317 = vrot.lane.b32.xlu0 %v1860_v39, %s1912_s16 }
0x142f   :  { %v1276_v35 = vpop.f32.mrb[34].mxu0  ;;  %v1611_v42 = vld [vmem:[%s2328_s6] ss:$0 sm:$0xff] }
0x1430   :  { %v1280_v43 = vadd.f32 %v2076_v56, %v1279_v41  ;;  %v1715_v44 = vpop.f32.mrb[35].mxu0 }
0x1432   :  { %1861 = vtanh.f32 %v1280_v43  ;;  %v1606_v49 = vmul.f32 -1.442695, %v1280_v43 }
0x1433   :  { %1863 = vpow2.f32 %v1607_v38 }
0x1434   :  { %1865 = vpow2.f32 %v1606_v49 }
0x143c   :  { %v1862_v16 = vpop.eup %1861 }
0x143d   :  { %1290 = vrot.lane.b32.xlu1 %v1862_v16, %s1912_s16  ;;  %v1864_v47 = vpop.eup %1863 }
0x143e   :  { %v1311_v50 = vadd.f32 1.0, %v1864_v47  ;;  %v1866_v51 = vpop.eup %1865 }
0x143f   :  { %v1284_v52 = vadd.f32 1.0, %v1866_v51 }
0x1440   :  { %1867 = vrcp.f32 %v1311_v50 }
0x1441   :  { %1869 = vrcp.f32 %v1284_v52 }
0x144a   :  { %v1868_v2 = vpop.eup %1867 }
0x144b   :  { %v1870_v1 = vpop.eup %1869  ;;  %v1315_v55 = vmul.f32 %v1868_v2, %v2239_v18 }
0x144c   :  { %v1288_v59 = vmul.f32 %v1870_v1, %v2243_v48 }
0x14a0   :  { %v1318_v6 = vpop.permute.xlu0 %1317 }
0x14a1   :  { %v1320_v7 = vmul.f32 %v1868_v2, %v1318_v6 }
0x14a3   :  { %1322 = vrot.lane.b32.xlu0 %v1320_v7, %s1912_s16 }
0x14af   :  { %v1291_v53 = vpop.permute.xlu1 %1290 }
0x14b0   :  { %v1293_v54 = vmul.f32 %v1870_v1, %v1291_v53 }
0x14b2   :  { %1295 = vrot.lane.b32.xlu1 %v1293_v54, %s1912_s16 }
0x1515   :  { %v1323_v57 = vpop.permute.xlu0 %1322 }
0x1516   :  { %v2275_v58 = vadd.f32 %v1323_v57, %v1315_v55 }
0x1518   :  { %1871 = vtanh.f32 %v2275_v58 }
0x1522   :  { %v1872_v14 = vpop.eup %1871 }
0x1523   :  { %1328 = vrot.lane.b32.xlu0 %v1872_v14, %s1912_s16 }
0x1524   :  { %v1296_v60 = vpop.permute.xlu1 %1295 }
0x1525   :  { %v1298_v61 = vadd.f32 %v1296_v60, %v1288_v59 }
0x1527   :  { %1873 = vtanh.f32 %v1298_v61 }
0x1531   :  { %v1874_v45 = vpop.eup %1873 }
0x1532   :  { %1301 = vrot.lane.b32.xlu1 %v1874_v45, %s1912_s16 }
0x1595   :  { %v1329_v62 = vpop.permute.xlu0 %1328 }
0x1596   :  { %v1331_v63 = vmul.f32 %v1868_v2, %v1329_v62 }
0x1598   :  { %v1332_v0 = vpack.c.bf16 %v1331_v63, %v1331_v63 }
0x159a   :  { %1334 = vrot.lane.b32.xlu0 %v1332_v0, %s1914_s0 }
0x15a4   :  { %v1302_v4 = vpop.permute.xlu1 %1301 }
0x15a5   :  { %v1304_v5 = vmul.f32 %v1870_v1, %v1302_v4 }
0x15a7   :  { %v1379_v8 = vpack.c.bf16 %v1304_v5, %v1304_v5 }
0x15a9   :  { %1381 = vrot.lane.b32.xlu1 %v1379_v8, %s1914_s0 }
0x160c   :  { %v1335_v9 = vpop.permute.xlu0 %1334 }
0x160d   :  { %1608 = vmatmul.mubr.msk.bf16.vlgmr.msra.gmra.mrb[32].mxu1 %vm32_vm2, %v1335_v9 }
0x160e   :  { %1728 = vmatprep.mubr.msk.bf16.mxu1 %vm1913_vm3, %v1911_v11  ;;  %1725 = vmatpush3.bf16.msra.mxu1 %v1753_v46 }
0x160f   :  { %1726 = vmatprep.subr.bf16.mxu1 %v1911_v11 }
0x1612   :  { %1727 = vmatpush3.bf16.msra.mxu1 %v1754_v3 }
0x161b   :  { %v1382_v10 = vpop.permute.xlu1 %1381 }
0x161c   :  { %1721 = vmatmul.mubr.msk.bf16.vlgmr.msra.gmra.mrb[36].mxu0 %vm32_vm2, %v1382_v10 }
0x16e0   :  { %v1373_v12 = vpop.f32.mrb[32].mxu1 }
0x16e1   :  { %v1374_v13 = vpop.f32.mrb[33].mxu1 }
0x16e2   :  { %v1376_v15 = vpop.f32.mrb[34].mxu1 }
0x16e3   :  { %v1377_v17 = vpop.f32.mrb[35].mxu1 }
0x16ef   :  { %v1420_v18 = vpop.f32.mrb[36].mxu0 }
0x16f0   :  { %v1426_v19 = vadd.f32 %v1420_v18, %v1374_v13  ;;  %v1722_v20 = vpop.f32.mrb[37].mxu0 }
0x16f1   :  { %v1423_v21 = vpop.f32.mrb[38].mxu0 }
0x16f2   :  { %v1427_v48 = vadd.f32 %v2076_v56, %v1426_v19  ;;  %v1723_v22 = vpop.f32.mrb[39].mxu0 }
0x16f4   :  { %1875 = vtanh.f32 %v1427_v48  ;;  %v1610_v24 = vmul.f32 -1.442695, %v1427_v48 }
0x16f6   :  { %1877 = vpow2.f32 %v1610_v24 }
0x16fe   :  { %v1876_v23 = vpop.eup %1875 }
0x16ff   :  { %1437 = vrot.lane.b32.xlu0 %v1876_v23, %s1912_s16 }
0x1700   :  { %v1878_v25 = vpop.eup %1877 }
0x1701   :  { %v1431_v26 = vadd.f32 1.0, %v1878_v25 }
0x1703   :  { %1879 = vrcp.f32 %v1431_v26 }
0x170d   :  { %v1880_v27 = vpop.eup %1879 }
0x170e   :  { %v1435_v30 = vmul.f32 %v1880_v27, %v1298_v61 }
0x1771   :  { %v1438_v28 = vpop.permute.xlu0 %1437 }
0x1772   :  { %v1440_v29 = vmul.f32 %v1880_v27, %v1438_v28 }
0x1774   :  { %1442 = vrot.lane.b32.xlu1 %v1440_v29, %s1912_s16 }
0x17e6   :  { %v1443_v31 = vpop.permute.xlu1 %1442 }
0x17e7   :  { %v1445_v32 = vadd.f32 %v1443_v31, %v1435_v30 }
0x17e9   :  { %1881 = vtanh.f32 %v1445_v32 }
0x17f3   :  { %v1882_v56 = vpop.eup %1881 }
0x17f4   :  { %1448 = vrot.lane.b32.xlu0 %v1882_v56, %s1912_s16 }
0x17f8   :  { %1453 = vrot.lane.b32.xlu0 %v1331_v63, %s1914_s0 }
0x1866   :  { %v1449_v33 = vpop.permute.xlu0 %1448 }
0x1867   :  { %v1451_v34 = vmul.f32 %v1880_v27, %v1449_v33 }
0x1869   :  { %v1475_v36 = vpack.c.bf16 %v1451_v34, %v1451_v34  ;;  %1463 = vrot.lane.b32.xlu0 %v1451_v34, %s1914_s0 }
0x186a   :  { %v1454_v37 = vpop.permute.xlu0 %1453 }
0x186b   :  { %1456 = vst.msk [vmem:[#allocation3] sm:$0xff] %vm32_vm2, %v1454_v37  ;;  %1488 = vrot.lane.b32.xlu1 %v1475_v36, %s1914_s0 }
0x186f   :  { %1458 = vrot.lane.b32.xlu1 %v2275_v58, %s1915_s11 }
0x1873   :  { %1468 = vrot.lane.b32.xlu1 %v1445_v32, %s1915_s11 }
0x18db   :  { %v1464_v39 = vpop.permute.xlu0 %1463 }
0x18dc   :  { %1466 = vst.msk [vmem:[#allocation5] sm:$0xff] %vm32_vm2, %v1464_v39 }
0x18dd   :  { %v1489_v11 = vpop.permute.xlu1 %1488 }
0x18de   :  { %1729 = vmatmul.mubr.msk.bf16.vlgmr.msra.gmra.mrb[36].mxu1 %vm32_vm2, %v1489_v11 }
0x18e1   :  { %v1459_v40 = vpop.permute.xlu1 %1458 }
0x18e2   :  { %1461 = vst.msk [vmem:[#allocation4] sm:$0xff] %vm32_vm2, %v1459_v40 }
0x18e5   :  { %v1469_v41 = vpop.permute.xlu1 %1468 }
0x18e6   :  { %1471 = vst.msk [vmem:[#allocation6] sm:$0xff] %vm32_vm2, %v1469_v41 }
0x19b1   :  { %v1539_v35 = vpop.f32.mrb[36].mxu1 }
0x19b2   :  { %v1540_v43 = vadd.f32 %v1611_v42, %v1539_v35  ;;  %v1730_v44 = vpop.f32.mrb[37].mxu1 }
0x19b3   :  { %v1542_v16 = vpop.f32.mrb[38].mxu1 }
0x19b4   :  { %v1731_v38 = vpop.f32.mrb[39].mxu1  ;;  %1546 = vst.msk [vmem:[#allocation7] sm:$0xff] %vm1545_vm4, %v1540_v43 }
0x19b5   :  { %1897 = shalt.err (!%p1894_p4)
}
0x19b6   :  { %s1898_s6 = scalar_lea.hbm %s2329_s7, 128 }
0x19b7   :  { %p1899_p5 = scmp.ne.s32.totalorder %s2329_s7, %s1898_s6  ;;  %p1902_p6 = scmp.lt.u32.totalorder %s1898_s6, %s2329_s7 }
0x19b9   :  { %p1904_p7 = pnand %p1902_p6, %p1899_p5 }
0x19bb   :  { %1907 = shalt.err (!%p1904_p7)
}
0x19bc   :  { %1556 = dma.vmem_to_hbm [thread:$0]  %s1554_s14, 128, %s2329_s7, [#allocation8]  }
0x19bd   :  { %1908 = dma.done.wait [#allocation8], 128  }
0x19be   :  { %1909 = vsyncadd [#allocation8], 4294967168 }
0x19bf   :  { %1560 = vsyncpa [#allocation8], 1 }

</bundles_post_ra>
